<compile_context>
chip_gen: v7x
topology: tpu7x:2x2x1
jax: 0.10.0
libtpu: 0.0.40
codegen_flags: <defaults>
</compile_context>

<pallas_src>
import functools

import jax
import jax.numpy as jnp
import numpy as np
from jax.experimental import pallas as pl
from jax.experimental.pallas import tpu as pltpu

LANE = 128


def _round_up(x, m):
    return (x + m - 1) // m * m


def lstm_fc_kernel(x_ref, wcat_ref, b_ref, wfc_ref, bfc_ref, out_ref):
    """Whole LSTM recurrence + final FC in one kernel invocation.

    x_ref:    (B, S, E)      embedded tokens, batch-major (no HBM transpose)
    wcat_ref: (Hp+E, 4*Hp)   fused [W_hh^T ; W_ih^T], per-gate lane-padded
    b_ref:    (1, 4*Hp)      b_ih + b_hh, per-gate lane-padded
    wfc_ref:  (Hp, Op)       FC weight (zero-padded rows/cols)
    bfc_ref:  (1, Op)
    out_ref:  (B, Op)        logits; first O lanes are real
    """
    B, S, E = x_ref.shape
    Hp = wfc_ref.shape[0]

    w_cat = wcat_ref[...]                                   # hoisted weight load
    bias = jnp.broadcast_to(b_ref[...], (B, 4 * Hp))        # hoisted broadcast

    h = jnp.zeros((B, Hp), jnp.float32)
    c = jnp.zeros((B, Hp), jnp.float32)

    # Fully-unrolled static time loop: h/c stay in vregs, every x / gate slice
    # is a static, 128-lane-aligned index, one fused MXU push per step.
    # TODO(synk): for large S, stream x in time chunks (pltpu.emit_pipeline /
    # manual double buffer) instead of holding the full (B,S,E) block.
    for t in range(S):
        x_t = x_ref[:, t, :]                                # (B, E)
        hx = jnp.concatenate([h, x_t], axis=-1)             # (B, Hp+E)
        gates = jnp.dot(hx, w_cat,
                        preferred_element_type=jnp.float32) + bias   # (B, 4Hp)
        i_g = jax.nn.sigmoid(gates[:, 0 * Hp:1 * Hp])
        f_g = jax.nn.sigmoid(gates[:, 1 * Hp:2 * Hp])
        g_g = jnp.tanh(gates[:, 2 * Hp:3 * Hp])
        o_g = jax.nn.sigmoid(gates[:, 3 * Hp:4 * Hp])
        c = f_g * c + i_g * g_g
        h = o_g * jnp.tanh(c)

    # Dropout(p=0) == identity; final Linear on the last hidden state.
    # Lane-dense (B, Op=128) store; real logits are lanes [:O].
    out_ref[...] = (jnp.dot(h, wfc_ref[...], preferred_element_type=jnp.float32)
                    + bfc_ref[...])


def pack_params(raw, lane=LANE):
    """Fuse / transpose / lane-pad PyTorch-layout params for the kernel."""
    E = raw["w_ih"].shape[1]
    H = raw["w_hh"].shape[1]
    O = raw["w_fc"].shape[0]
    Hp = _round_up(H, lane)
    Op = _round_up(O, lane)

    def pad_gate_cols(w_t):                  # (K, 4H) -> (K, 4Hp), per-gate zero pad
        K = w_t.shape[0]
        w4 = w_t.reshape(K, 4, H)
        return jnp.pad(w4, ((0, 0), (0, 0), (0, Hp - H))).reshape(K, 4 * Hp)

    w_hh_t = pad_gate_cols(raw["w_hh"].T)                     # (H, 4Hp)
    w_hh_t = jnp.pad(w_hh_t, ((0, Hp - H), (0, 0)))           # (Hp, 4Hp)
    w_ih_t = pad_gate_cols(raw["w_ih"].T)                     # (E, 4Hp)
    w_cat = jnp.concatenate([w_hh_t, w_ih_t], axis=0)         # (Hp+E, 4Hp), order [h, x]

    b = (raw["b_ih"] + raw["b_hh"]).reshape(4, H)
    b = jnp.pad(b, ((0, 0), (0, Hp - H))).reshape(1, 4 * Hp)

    w_fc_t = jnp.pad(raw["w_fc"].T, ((0, Hp - H), (0, Op - O)))  # (Hp, Op)
    b_fc = jnp.pad(raw["b_fc"], (0, Op - O)).reshape(1, Op)

    kparams = {"embedding": raw["embedding"].astype(jnp.float32),
               "w_cat": w_cat, "b": b, "w_fc_t": w_fc_t, "b_fc": b_fc}
    return kparams, O


@functools.partial(jax.jit, static_argnames=("output_dim",))
def rnn_hate_speech_forward(tokens, kparams, output_dim):
    """tokens: (B, S) int32 -> logits (B, output_dim) float32."""
    # Embedding gather kept as plain-JAX glue (tiny at these shapes; at
    # production vocab/seq sizes this should become an in-kernel
    # scalar-prefetch row gather to avoid materializing (B,S,E) in HBM).
    x = jnp.take(kparams["embedding"], tokens, axis=0).astype(jnp.float32)  # (B,S,E)
    B = x.shape[0]
    Op = kparams["w_fc_t"].shape[1]

    vmem = pl.BlockSpec(memory_space=pltpu.MemorySpace.VMEM)
    out = pl.pallas_call(
        lstm_fc_kernel,
        out_shape=jax.ShapeDtypeStruct((B, Op), jnp.float32),
        in_specs=[vmem, vmem, vmem, vmem, vmem],
        out_specs=vmem,
    )(x, kparams["w_cat"], kparams["b"], kparams["w_fc_t"], kparams["b_fc"])
    return out[:, :output_dim]


def reference_forward(tokens, raw):
    """Pure-JAX reference (lax.scan LSTM, PyTorch-layout params)."""
    emb = jnp.take(raw["embedding"], tokens, axis=0).astype(jnp.float32)
    B, S, E = emb.shape
    H = raw["w_hh"].shape[1]
    w_ih_t = raw["w_ih"].T
    w_hh_t = raw["w_hh"].T
    b = raw["b_ih"] + raw["b_hh"]

    def step(carry, x_t):
        h, c = carry
        gates = x_t @ w_ih_t + h @ w_hh_t + b
        i, f, g, o = jnp.split(gates, 4, axis=-1)
        c = jax.nn.sigmoid(f) * c + jax.nn.sigmoid(i) * jnp.tanh(g)
        h = jax.nn.sigmoid(o) * jnp.tanh(c)
        return (h, c), None

    h0 = jnp.zeros((B, H), jnp.float32)
    (h_last, _), _ = jax.lax.scan(step, (h0, h0), jnp.transpose(emb, (1, 0, 2)))
    return h_last @ raw["w_fc"].T + raw["b_fc"]


def init_params(key, vocab_size, embed_dim, hidden_dim, output_dim):
    """Raw params in PyTorch layout: W_ih (4H,E), W_hh (4H,H), fc.weight (O,H)."""
    ks = jax.random.split(key, 7)
    u = lambda k, shape, s=0.1: jax.random.uniform(k, shape, jnp.float32, -s, s)
    return {
        "embedding": u(ks[0], (vocab_size, embed_dim)),
        "w_ih": u(ks[1], (4 * hidden_dim, embed_dim)),
        "w_hh": u(ks[2], (4 * hidden_dim, hidden_dim)),
        "b_ih": u(ks[3], (4 * hidden_dim,)),
        "b_hh": u(ks[4], (4 * hidden_dim,)),
        "w_fc": u(ks[5], (output_dim, hidden_dim)),
        "b_fc": u(ks[6], (output_dim,)),
    }


if __name__ == "__main__":
    VOCAB, EMBED, HIDDEN, OUT = 100, 32, 32, 4
    BATCH, SEQ = 8, 8

    key = jax.random.PRNGKey(0)
    pkey, tkey = jax.random.split(key)
    raw = init_params(pkey, VOCAB, EMBED, HIDDEN, OUT)
    tokens = jax.random.randint(tkey, (BATCH, SEQ), 0, VOCAB, dtype=jnp.int32)

    kparams, out_dim = pack_params(raw)
    out = rnn_hate_speech_forward(tokens, kparams, output_dim=out_dim)
    out = jax.block_until_ready(out)

    ref = reference_forward(tokens, raw)
    # Tolerance absorbs MXU default-precision / summation-grouping differences
    # between the fused in-kernel dot and the reference's split dots; genuine
    # bugs (gate order, padding, fusion layout) produce O(0.1) errors.
    np.testing.assert_allclose(np.asarray(out), np.asarray(ref),
                               rtol=1e-3, atol=1e-3)

    print("KERNEL_OK")
</pallas_src>

<mosaic_0001>
module attributes {stable_mosaic.version = 11 : i64} {
  func.func @lstm_fc_kernel(%arg0: memref<8x8x32xf32, #tpu.memory_space<vmem>>, %arg1: memref<160x512xf32, #tpu.memory_space<vmem>>, %arg2: memref<1x512xf32, #tpu.memory_space<vmem>>, %arg3: memref<128x128xf32, #tpu.memory_space<vmem>>, %arg4: memref<1x128xf32, #tpu.memory_space<vmem>>, %arg5: memref<8x128xf32, #tpu.memory_space<vmem>>) attributes {dimension_semantics = [], scalar_prefetch = 0 : i64, scratch_operands = 0 : i64, tpu.core_type = #tpu.core_type<tc>} {
    %c0 = arith.constant 0 : index
    %c0_0 = arith.constant 0 : index
    %0 = vector.load %arg1[%c0, %c0_0] : memref<160x512xf32, #tpu.memory_space<vmem>>, vector<160x512xf32>
    %c0_1 = arith.constant 0 : index
    %c0_2 = arith.constant 0 : index
    %1 = vector.load %arg2[%c0_1, %c0_2] : memref<1x512xf32, #tpu.memory_space<vmem>>, vector<1x512xf32>
    %2 = vector.shape_cast %1 : vector<1x512xf32> to vector<1x512xf32>
    %3 = vector.broadcast %2 : vector<1x512xf32> to vector<8x512xf32>
    %cst = arith.constant 0.000000e+00 : f32
    %4 = vector.broadcast %cst : f32 to vector<8x128xf32>
    %cst_3 = arith.constant 0.000000e+00 : f32
    %5 = vector.broadcast %cst_3 : f32 to vector<8x128xf32>
    %c0_4 = arith.constant 0 : index
    %c0_5 = arith.constant 0 : index
    %c0_6 = arith.constant 0 : index
    %6 = vector.load %arg0[%c0_4, %c0_5, %c0_6] : memref<8x8x32xf32, #tpu.memory_space<vmem>>, vector<8x1x32xf32>
    %7 = vector.shape_cast %6 : vector<8x1x32xf32> to vector<8x32xf32>
    %8 = tpu.concatenate %4, %7 in 1 : vector<8x128xf32>, vector<8x32xf32> -> vector<8x160xf32>
    %cst_7 = arith.constant dense<0.000000e+00> : vector<8x512xf32>
    %9 = tpu.matmul %8, %0, %cst_7 {dimension_numbers = #tpu.dot_dimension_numbers<[1], [0], [0], [1], [0, 0, 1, 1], [], []>} : vector<8x160xf32>, vector<160x512xf32>, vector<8x512xf32> -> vector<8x512xf32>
    %10 = arith.addf %9, %3 : vector<8x512xf32>
    %11 = vector.extract_strided_slice %10 {offsets = [0, 0], sizes = [8, 128], strides = [1, 1]} : vector<8x512xf32> to vector<8x128xf32>
    %12 = arith.negf %11 : vector<8x128xf32>
    %13 = math.exp %12 : vector<8x128xf32>
    %cst_8 = arith.constant 1.000000e+00 : f32
    %14 = vector.broadcast %cst_8 : f32 to vector<8x128xf32>
    %15 = arith.addf %14, %13 : vector<8x128xf32>
    %16 = arith.divf %14, %15 : vector<8x128xf32>
    %17 = vector.extract_strided_slice %10 {offsets = [0, 128], sizes = [8, 128], strides = [1, 1]} : vector<8x512xf32> to vector<8x128xf32>
    %18 = arith.negf %17 : vector<8x128xf32>
    %19 = math.exp %18 : vector<8x128xf32>
    %cst_9 = arith.constant 1.000000e+00 : f32
    %20 = vector.broadcast %cst_9 : f32 to vector<8x128xf32>
    %21 = arith.addf %20, %19 : vector<8x128xf32>
    %22 = arith.divf %20, %21 : vector<8x128xf32>
    %23 = vector.extract_strided_slice %10 {offsets = [0, 256], sizes = [8, 128], strides = [1, 1]} : vector<8x512xf32> to vector<8x128xf32>
    %24 = math.tanh %23 : vector<8x128xf32>
    %25 = vector.extract_strided_slice %10 {offsets = [0, 384], sizes = [8, 128], strides = [1, 1]} : vector<8x512xf32> to vector<8x128xf32>
    %26 = arith.negf %25 : vector<8x128xf32>
    %27 = math.exp %26 : vector<8x128xf32>
    %cst_10 = arith.constant 1.000000e+00 : f32
    %28 = vector.broadcast %cst_10 : f32 to vector<8x128xf32>
    %29 = arith.addf %28, %27 : vector<8x128xf32>
    %30 = arith.divf %28, %29 : vector<8x128xf32>
    %31 = arith.mulf %22, %5 : vector<8x128xf32>
    %32 = arith.mulf %16, %24 : vector<8x128xf32>
    %33 = arith.addf %31, %32 : vector<8x128xf32>
    %34 = math.tanh %33 : vector<8x128xf32>
    %35 = arith.mulf %30, %34 : vector<8x128xf32>
    %c0_11 = arith.constant 0 : index
    %c1 = arith.constant 1 : index
    %c0_12 = arith.constant 0 : index
    %36 = vector.load %arg0[%c0_11, %c1, %c0_12] : memref<8x8x32xf32, #tpu.memory_space<vmem>>, vector<8x1x32xf32>
    %37 = vector.shape_cast %36 : vector<8x1x32xf32> to vector<8x32xf32>
    %38 = tpu.concatenate %35, %37 in 1 : vector<8x128xf32>, vector<8x32xf32> -> vector<8x160xf32>
    %cst_13 = arith.constant dense<0.000000e+00> : vector<8x512xf32>
    %39 = tpu.matmul %38, %0, %cst_13 {dimension_numbers = #tpu.dot_dimension_numbers<[1], [0], [0], [1], [0, 0, 1, 1], [], []>} : vector<8x160xf32>, vector<160x512xf32>, vector<8x512xf32> -> vector<8x512xf32>
    %40 = arith.addf %39, %3 : vector<8x512xf32>
    %41 = vector.extract_strided_slice %40 {offsets = [0, 0], sizes = [8, 128], strides = [1, 1]} : vector<8x512xf32> to vector<8x128xf32>
    %42 = arith.negf %41 : vector<8x128xf32>
    %43 = math.exp %42 : vector<8x128xf32>
    %cst_14 = arith.constant 1.000000e+00 : f32
    %44 = vector.broadcast %cst_14 : f32 to vector<8x128xf32>
    %45 = arith.addf %44, %43 : vector<8x128xf32>
    %46 = arith.divf %44, %45 : vector<8x128xf32>
    %47 = vector.extract_strided_slice %40 {offsets = [0, 128], sizes = [8, 128], strides = [1, 1]} : vector<8x512xf32> to vector<8x128xf32>
    %48 = arith.negf %47 : vector<8x128xf32>
    %49 = math.exp %48 : vector<8x128xf32>
    %cst_15 = arith.constant 1.000000e+00 : f32
    %50 = vector.broadcast %cst_15 : f32 to vector<8x128xf32>
    %51 = arith.addf %50, %49 : vector<8x128xf32>
    %52 = arith.divf %50, %51 : vector<8x128xf32>
    %53 = vector.extract_strided_slice %40 {offsets = [0, 256], sizes = [8, 128], strides = [1, 1]} : vector<8x512xf32> to vector<8x128xf32>
    %54 = math.tanh %53 : vector<8x128xf32>
    %55 = vector.extract_strided_slice %40 {offsets = [0, 384], sizes = [8, 128], strides = [1, 1]} : vector<8x512xf32> to vector<8x128xf32>
    %56 = arith.negf %55 : vector<8x128xf32>
    %57 = math.exp %56 : vector<8x128xf32>
    %cst_16 = arith.constant 1.000000e+00 : f32
    %58 = vector.broadcast %cst_16 : f32 to vector<8x128xf32>
    %59 = arith.addf %58, %57 : vector<8x128xf32>
    %60 = arith.divf %58, %59 : vector<8x128xf32>
    %61 = arith.mulf %52, %33 : vector<8x128xf32>
    %62 = arith.mulf %46, %54 : vector<8x128xf32>
    %63 = arith.addf %61, %62 : vector<8x128xf32>
    %64 = math.tanh %63 : vector<8x128xf32>
    %65 = arith.mulf %60, %64 : vector<8x128xf32>
    %c0_17 = arith.constant 0 : index
    %c2 = arith.constant 2 : index
    %c0_18 = arith.constant 0 : index
    %66 = vector.load %arg0[%c0_17, %c2, %c0_18] : memref<8x8x32xf32, #tpu.memory_space<vmem>>, vector<8x1x32xf32>
    %67 = vector.shape_cast %66 : vector<8x1x32xf32> to vector<8x32xf32>
    %68 = tpu.concatenate %65, %67 in 1 : vector<8x128xf32>, vector<8x32xf32> -> vector<8x160xf32>
    %cst_19 = arith.constant dense<0.000000e+00> : vector<8x512xf32>
    %69 = tpu.matmul %68, %0, %cst_19 {dimension_numbers = #tpu.dot_dimension_numbers<[1], [0], [0], [1], [0, 0, 1, 1], [], []>} : vector<8x160xf32>, vector<160x512xf32>, vector<8x512xf32> -> vector<8x512xf32>
    %70 = arith.addf %69, %3 : vector<8x512xf32>
    %71 = vector.extract_strided_slice %70 {offsets = [0, 0], sizes = [8, 128], strides = [1, 1]} : vector<8x512xf32> to vector<8x128xf32>
    %72 = arith.negf %71 : vector<8x128xf32>
    %73 = math.exp %72 : vector<8x128xf32>
    %cst_20 = arith.constant 1.000000e+00 : f32
    %74 = vector.broadcast %cst_20 : f32 to vector<8x128xf32>
    %75 = arith.addf %74, %73 : vector<8x128xf32>
    %76 = arith.divf %74, %75 : vector<8x128xf32>
    %77 = vector.extract_strided_slice %70 {offsets = [0, 128], sizes = [8, 128], strides = [1, 1]} : vector<8x512xf32> to vector<8x128xf32>
    %78 = arith.negf %77 : vector<8x128xf32>
    %79 = math.exp %78 : vector<8x128xf32>
    %cst_21 = arith.constant 1.000000e+00 : f32
    %80 = vector.broadcast %cst_21 : f32 to vector<8x128xf32>
    %81 = arith.addf %80, %79 : vector<8x128xf32>
    %82 = arith.divf %80, %81 : vector<8x128xf32>
    %83 = vector.extract_strided_slice %70 {offsets = [0, 256], sizes = [8, 128], strides = [1, 1]} : vector<8x512xf32> to vector<8x128xf32>
    %84 = math.tanh %83 : vector<8x128xf32>
    %85 = vector.extract_strided_slice %70 {offsets = [0, 384], sizes = [8, 128], strides = [1, 1]} : vector<8x512xf32> to vector<8x128xf32>
    %86 = arith.negf %85 : vector<8x128xf32>
    %87 = math.exp %86 : vector<8x128xf32>
    %cst_22 = arith.constant 1.000000e+00 : f32
    %88 = vector.broadcast %cst_22 : f32 to vector<8x128xf32>
    %89 = arith.addf %88, %87 : vector<8x128xf32>
    %90 = arith.divf %88, %89 : vector<8x128xf32>
    %91 = arith.mulf %82, %63 : vector<8x128xf32>
    %92 = arith.mulf %76, %84 : vector<8x128xf32>
    %93 = arith.addf %91, %92 : vector<8x128xf32>
    %94 = math.tanh %93 : vector<8x128xf32>
    %95 = arith.mulf %90, %94 : vector<8x128xf32>
    %c0_23 = arith.constant 0 : index
    %c3 = arith.constant 3 : index
    %c0_24 = arith.constant 0 : index
    %96 = vector.load %arg0[%c0_23, %c3, %c0_24] : memref<8x8x32xf32, #tpu.memory_space<vmem>>, vector<8x1x32xf32>
    %97 = vector.shape_cast %96 : vector<8x1x32xf32> to vector<8x32xf32>
    %98 = tpu.concatenate %95, %97 in 1 : vector<8x128xf32>, vector<8x32xf32> -> vector<8x160xf32>
    %cst_25 = arith.constant dense<0.000000e+00> : vector<8x512xf32>
    %99 = tpu.matmul %98, %0, %cst_25 {dimension_numbers = #tpu.dot_dimension_numbers<[1], [0], [0], [1], [0, 0, 1, 1], [], []>} : vector<8x160xf32>, vector<160x512xf32>, vector<8x512xf32> -> vector<8x512xf32>
    %100 = arith.addf %99, %3 : vector<8x512xf32>
    %101 = vector.extract_strided_slice %100 {offsets = [0, 0], sizes = [8, 128], strides = [1, 1]} : vector<8x512xf32> to vector<8x128xf32>
    %102 = arith.negf %101 : vector<8x128xf32>
    %103 = math.exp %102 : vector<8x128xf32>
    %cst_26 = arith.constant 1.000000e+00 : f32
    %104 = vector.broadcast %cst_26 : f32 to vector<8x128xf32>
    %105 = arith.addf %104, %103 : vector<8x128xf32>
    %106 = arith.divf %104, %105 : vector<8x128xf32>
    %107 = vector.extract_strided_slice %100 {offsets = [0, 128], sizes = [8, 128], strides = [1, 1]} : vector<8x512xf32> to vector<8x128xf32>
    %108 = arith.negf %107 : vector<8x128xf32>
    %109 = math.exp %108 : vector<8x128xf32>
    %cst_27 = arith.constant 1.000000e+00 : f32
    %110 = vector.broadcast %cst_27 : f32 to vector<8x128xf32>
    %111 = arith.addf %110, %109 : vector<8x128xf32>
    %112 = arith.divf %110, %111 : vector<8x128xf32>
    %113 = vector.extract_strided_slice %100 {offsets = [0, 256], sizes = [8, 128], strides = [1, 1]} : vector<8x512xf32> to vector<8x128xf32>
    %114 = math.tanh %113 : vector<8x128xf32>
    %115 = vector.extract_strided_slice %100 {offsets = [0, 384], sizes = [8, 128], strides = [1, 1]} : vector<8x512xf32> to vector<8x128xf32>
    %116 = arith.negf %115 : vector<8x128xf32>
    %117 = math.exp %116 : vector<8x128xf32>
    %cst_28 = arith.constant 1.000000e+00 : f32
    %118 = vector.broadcast %cst_28 : f32 to vector<8x128xf32>
    %119 = arith.addf %118, %117 : vector<8x128xf32>
    %120 = arith.divf %118, %119 : vector<8x128xf32>
    %121 = arith.mulf %112, %93 : vector<8x128xf32>
    %122 = arith.mulf %106, %114 : vector<8x128xf32>
    %123 = arith.addf %121, %122 : vector<8x128xf32>
    %124 = math.tanh %123 : vector<8x128xf32>
    %125 = arith.mulf %120, %124 : vector<8x128xf32>
    %c0_29 = arith.constant 0 : index
    %c4 = arith.constant 4 : index
    %c0_30 = arith.constant 0 : index
    %126 = vector.load %arg0[%c0_29, %c4, %c0_30] : memref<8x8x32xf32, #tpu.memory_space<vmem>>, vector<8x1x32xf32>
    %127 = vector.shape_cast %126 : vector<8x1x32xf32> to vector<8x32xf32>
    %128 = tpu.concatenate %125, %127 in 1 : vector<8x128xf32>, vector<8x32xf32> -> vector<8x160xf32>
    %cst_31 = arith.constant dense<0.000000e+00> : vector<8x512xf32>
    %129 = tpu.matmul %128, %0, %cst_31 {dimension_numbers = #tpu.dot_dimension_numbers<[1], [0], [0], [1], [0, 0, 1, 1], [], []>} : vector<8x160xf32>, vector<160x512xf32>, vector<8x512xf32> -> vector<8x512xf32>
    %130 = arith.addf %129, %3 : vector<8x512xf32>
    %131 = vector.extract_strided_slice %130 {offsets = [0, 0], sizes = [8, 128], strides = [1, 1]} : vector<8x512xf32> to vector<8x128xf32>
    %132 = arith.negf %131 : vector<8x128xf32>
    %133 = math.exp %132 : vector<8x128xf32>
    %cst_32 = arith.constant 1.000000e+00 : f32
    %134 = vector.broadcast %cst_32 : f32 to vector<8x128xf32>
    %135 = arith.addf %134, %133 : vector<8x128xf32>
    %136 = arith.divf %134, %135 : vector<8x128xf32>
    %137 = vector.extract_strided_slice %130 {offsets = [0, 128], sizes = [8, 128], strides = [1, 1]} : vector<8x512xf32> to vector<8x128xf32>
    %138 = arith.negf %137 : vector<8x128xf32>
    %139 = math.exp %138 : vector<8x128xf32>
    %cst_33 = arith.constant 1.000000e+00 : f32
    %140 = vector.broadcast %cst_33 : f32 to vector<8x128xf32>
    %141 = arith.addf %140, %139 : vector<8x128xf32>
    %142 = arith.divf %140, %141 : vector<8x128xf32>
    %143 = vector.extract_strided_slice %130 {offsets = [0, 256], sizes = [8, 128], strides = [1, 1]} : vector<8x512xf32> to vector<8x128xf32>
    %144 = math.tanh %143 : vector<8x128xf32>
    %145 = vector.extract_strided_slice %130 {offsets = [0, 384], sizes = [8, 128], strides = [1, 1]} : vector<8x512xf32> to vector<8x128xf32>
    %146 = arith.negf %145 : vector<8x128xf32>
    %147 = math.exp %146 : vector<8x128xf32>
    %cst_34 = arith.constant 1.000000e+00 : f32
    %148 = vector.broadcast %cst_34 : f32 to vector<8x128xf32>
    %149 = arith.addf %148, %147 : vector<8x128xf32>
    %150 = arith.divf %148, %149 : vector<8x128xf32>
    %151 = arith.mulf %142, %123 : vector<8x128xf32>
    %152 = arith.mulf %136, %144 : vector<8x128xf32>
    %153 = arith.addf %151, %152 : vector<8x128xf32>
    %154 = math.tanh %153 : vector<8x128xf32>
    %155 = arith.mulf %150, %154 : vector<8x128xf32>
    %c0_35 = arith.constant 0 : index
    %c5 = arith.constant 5 : index
    %c0_36 = arith.constant 0 : index
    %156 = vector.load %arg0[%c0_35, %c5, %c0_36] : memref<8x8x32xf32, #tpu.memory_space<vmem>>, vector<8x1x32xf32>
    %157 = vector.shape_cast %156 : vector<8x1x32xf32> to vector<8x32xf32>
    %158 = tpu.concatenate %155, %157 in 1 : vector<8x128xf32>, vector<8x32xf32> -> vector<8x160xf32>
    %cst_37 = arith.constant dense<0.000000e+00> : vector<8x512xf32>
    %159 = tpu.matmul %158, %0, %cst_37 {dimension_numbers = #tpu.dot_dimension_numbers<[1], [0], [0], [1], [0, 0, 1, 1], [], []>} : vector<8x160xf32>, vector<160x512xf32>, vector<8x512xf32> -> vector<8x512xf32>
    %160 = arith.addf %159, %3 : vector<8x512xf32>
    %161 = vector.extract_strided_slice %160 {offsets = [0, 0], sizes = [8, 128], strides = [1, 1]} : vector<8x512xf32> to vector<8x128xf32>
    %162 = arith.negf %161 : vector<8x128xf32>
    %163 = math.exp %162 : vector<8x128xf32>
    %cst_38 = arith.constant 1.000000e+00 : f32
    %164 = vector.broadcast %cst_38 : f32 to vector<8x128xf32>
    %165 = arith.addf %164, %163 : vector<8x128xf32>
    %166 = arith.divf %164, %165 : vector<8x128xf32>
    %167 = vector.extract_strided_slice %160 {offsets = [0, 128], sizes = [8, 128], strides = [1, 1]} : vector<8x512xf32> to vector<8x128xf32>
    %168 = arith.negf %167 : vector<8x128xf32>
    %169 = math.exp %168 : vector<8x128xf32>
    %cst_39 = arith.constant 1.000000e+00 : f32
    %170 = vector.broadcast %cst_39 : f32 to vector<8x128xf32>
    %171 = arith.addf %170, %169 : vector<8x128xf32>
    %172 = arith.divf %170, %171 : vector<8x128xf32>
    %173 = vector.extract_strided_slice %160 {offsets = [0, 256], sizes = [8, 128], strides = [1, 1]} : vector<8x512xf32> to vector<8x128xf32>
    %174 = math.tanh %173 : vector<8x128xf32>
    %175 = vector.extract_strided_slice %160 {offsets = [0, 384], sizes = [8, 128], strides = [1, 1]} : vector<8x512xf32> to vector<8x128xf32>
    %176 = arith.negf %175 : vector<8x128xf32>
    %177 = math.exp %176 : vector<8x128xf32>
    %cst_40 = arith.constant 1.000000e+00 : f32
    %178 = vector.broadcast %cst_40 : f32 to vector<8x128xf32>
    %179 = arith.addf %178, %177 : vector<8x128xf32>
    %180 = arith.divf %178, %179 : vector<8x128xf32>
    %181 = arith.mulf %172, %153 : vector<8x128xf32>
    %182 = arith.mulf %166, %174 : vector<8x128xf32>
    %183 = arith.addf %181, %182 : vector<8x128xf32>
    %184 = math.tanh %183 : vector<8x128xf32>
    %185 = arith.mulf %180, %184 : vector<8x128xf32>
    %c0_41 = arith.constant 0 : index
    %c6 = arith.constant 6 : index
    %c0_42 = arith.constant 0 : index
    %186 = vector.load %arg0[%c0_41, %c6, %c0_42] : memref<8x8x32xf32, #tpu.memory_space<vmem>>, vector<8x1x32xf32>
    %187 = vector.shape_cast %186 : vector<8x1x32xf32> to vector<8x32xf32>
    %188 = tpu.concatenate %185, %187 in 1 : vector<8x128xf32>, vector<8x32xf32> -> vector<8x160xf32>
    %cst_43 = arith.constant dense<0.000000e+00> : vector<8x512xf32>
    %189 = tpu.matmul %188, %0, %cst_43 {dimension_numbers = #tpu.dot_dimension_numbers<[1], [0], [0], [1], [0, 0, 1, 1], [], []>} : vector<8x160xf32>, vector<160x512xf32>, vector<8x512xf32> -> vector<8x512xf32>
    %190 = arith.addf %189, %3 : vector<8x512xf32>
    %191 = vector.extract_strided_slice %190 {offsets = [0, 0], sizes = [8, 128], strides = [1, 1]} : vector<8x512xf32> to vector<8x128xf32>
    %192 = arith.negf %191 : vector<8x128xf32>
    %193 = math.exp %192 : vector<8x128xf32>
    %cst_44 = arith.constant 1.000000e+00 : f32
    %194 = vector.broadcast %cst_44 : f32 to vector<8x128xf32>
    %195 = arith.addf %194, %193 : vector<8x128xf32>
    %196 = arith.divf %194, %195 : vector<8x128xf32>
    %197 = vector.extract_strided_slice %190 {offsets = [0, 128], sizes = [8, 128], strides = [1, 1]} : vector<8x512xf32> to vector<8x128xf32>
    %198 = arith.negf %197 : vector<8x128xf32>
    %199 = math.exp %198 : vector<8x128xf32>
    %cst_45 = arith.constant 1.000000e+00 : f32
    %200 = vector.broadcast %cst_45 : f32 to vector<8x128xf32>
    %201 = arith.addf %200, %199 : vector<8x128xf32>
    %202 = arith.divf %200, %201 : vector<8x128xf32>
    %203 = vector.extract_strided_slice %190 {offsets = [0, 256], sizes = [8, 128], strides = [1, 1]} : vector<8x512xf32> to vector<8x128xf32>
    %204 = math.tanh %203 : vector<8x128xf32>
    %205 = vector.extract_strided_slice %190 {offsets = [0, 384], sizes = [8, 128], strides = [1, 1]} : vector<8x512xf32> to vector<8x128xf32>
    %206 = arith.negf %205 : vector<8x128xf32>
    %207 = math.exp %206 : vector<8x128xf32>
    %cst_46 = arith.constant 1.000000e+00 : f32
    %208 = vector.broadcast %cst_46 : f32 to vector<8x128xf32>
    %209 = arith.addf %208, %207 : vector<8x128xf32>
    %210 = arith.divf %208, %209 : vector<8x128xf32>
    %211 = arith.mulf %202, %183 : vector<8x128xf32>
    %212 = arith.mulf %196, %204 : vector<8x128xf32>
    %213 = arith.addf %211, %212 : vector<8x128xf32>
    %214 = math.tanh %213 : vector<8x128xf32>
    %215 = arith.mulf %210, %214 : vector<8x128xf32>
    %c0_47 = arith.constant 0 : index
    %c7 = arith.constant 7 : index
    %c0_48 = arith.constant 0 : index
    %216 = vector.load %arg0[%c0_47, %c7, %c0_48] : memref<8x8x32xf32, #tpu.memory_space<vmem>>, vector<8x1x32xf32>
    %217 = vector.shape_cast %216 : vector<8x1x32xf32> to vector<8x32xf32>
    %218 = tpu.concatenate %215, %217 in 1 : vector<8x128xf32>, vector<8x32xf32> -> vector<8x160xf32>
    %cst_49 = arith.constant dense<0.000000e+00> : vector<8x512xf32>
    %219 = tpu.matmul %218, %0, %cst_49 {dimension_numbers = #tpu.dot_dimension_numbers<[1], [0], [0], [1], [0, 0, 1, 1], [], []>} : vector<8x160xf32>, vector<160x512xf32>, vector<8x512xf32> -> vector<8x512xf32>
    %220 = arith.addf %219, %3 : vector<8x512xf32>
    %221 = vector.extract_strided_slice %220 {offsets = [0, 0], sizes = [8, 128], strides = [1, 1]} : vector<8x512xf32> to vector<8x128xf32>
    %222 = arith.negf %221 : vector<8x128xf32>
    %223 = math.exp %222 : vector<8x128xf32>
    %cst_50 = arith.constant 1.000000e+00 : f32
    %224 = vector.broadcast %cst_50 : f32 to vector<8x128xf32>
    %225 = arith.addf %224, %223 : vector<8x128xf32>
    %226 = arith.divf %224, %225 : vector<8x128xf32>
    %227 = vector.extract_strided_slice %220 {offsets = [0, 128], sizes = [8, 128], strides = [1, 1]} : vector<8x512xf32> to vector<8x128xf32>
    %228 = arith.negf %227 : vector<8x128xf32>
    %229 = math.exp %228 : vector<8x128xf32>
    %cst_51 = arith.constant 1.000000e+00 : f32
    %230 = vector.broadcast %cst_51 : f32 to vector<8x128xf32>
    %231 = arith.addf %230, %229 : vector<8x128xf32>
    %232 = arith.divf %230, %231 : vector<8x128xf32>
    %233 = vector.extract_strided_slice %220 {offsets = [0, 256], sizes = [8, 128], strides = [1, 1]} : vector<8x512xf32> to vector<8x128xf32>
    %234 = math.tanh %233 : vector<8x128xf32>
    %235 = vector.extract_strided_slice %220 {offsets = [0, 384], sizes = [8, 128], strides = [1, 1]} : vector<8x512xf32> to vector<8x128xf32>
    %236 = arith.negf %235 : vector<8x128xf32>
    %237 = math.exp %236 : vector<8x128xf32>
    %cst_52 = arith.constant 1.000000e+00 : f32
    %238 = vector.broadcast %cst_52 : f32 to vector<8x128xf32>
    %239 = arith.addf %238, %237 : vector<8x128xf32>
    %240 = arith.divf %238, %239 : vector<8x128xf32>
    %241 = arith.mulf %232, %213 : vector<8x128xf32>
    %242 = arith.mulf %226, %234 : vector<8x128xf32>
    %243 = arith.addf %241, %242 : vector<8x128xf32>
    %244 = math.tanh %243 : vector<8x128xf32>
    %245 = arith.mulf %240, %244 : vector<8x128xf32>
    %c0_53 = arith.constant 0 : index
    %c0_54 = arith.constant 0 : index
    %246 = vector.load %arg3[%c0_53, %c0_54] : memref<128x128xf32, #tpu.memory_space<vmem>>, vector<128x128xf32>
    %cst_55 = arith.constant dense<0.000000e+00> : vector<8x128xf32>
    %247 = tpu.matmul %245, %246, %cst_55 {dimension_numbers = #tpu.dot_dimension_numbers<[1], [0], [0], [1], [0, 0, 1, 1], [], []>} : vector<8x128xf32>, vector<128x128xf32>, vector<8x128xf32> -> vector<8x128xf32>
    %c0_56 = arith.constant 0 : index
    %c0_57 = arith.constant 0 : index
    %248 = vector.load %arg4[%c0_56, %c0_57] : memref<1x128xf32, #tpu.memory_space<vmem>>, vector<1x128xf32>
    %249 = vector.broadcast %248 : vector<1x128xf32> to vector<8x128xf32>
    %250 = arith.addf %247, %249 : vector<8x128xf32>
    %c0_58 = arith.constant 0 : index
    %c0_59 = arith.constant 0 : index
    %251 = vector.load %arg5[%c0_58, %c0_59] : memref<8x128xf32, #tpu.memory_space<vmem>>, vector<8x128xf32>
    tpu.vector_store %arg5[%c0_58, %c0_59], %250 {strides = array<i32>} : memref<8x128xf32, #tpu.memory_space<vmem>>, vector<8x128xf32>,
    return
  }
}

</mosaic_0001>

<bundles_post_ra>
// kernel: rnn_hate_speech_forward.1
= control target key start
LH: loop header
LB: loop body
LE: loop exit
PB: predicated region body
PF: predicated region fallthrough
CT: control target
= control target key end

     0   :  { %vm139_vm0 = vcmask 1041409   ;;  %vm142_vm1 = vcmask 1042434   ;;  %vm145_vm2 = vcmask 1043459   ;;  %vm148_vm3 = vcmask 1044484   ;;  %s3765_s1 = inlined_call_operand.vmem [shape: f32[160,512], index: 1, kind: input, shape index: {}]   ;;  %s3766_s0 = inlined_call_operand.vmem [shape: f32[8,8,32], index: 0, kind: input, shape index: {}]   ;;  %s3767_s2 = inlined_call_operand.vmem [shape: f32[1,512], index: 2, kind: input, shape index: {}]   ;;  %s3768_s3 = inlined_call_operand.vmem [shape: f32[128,128], index: 3, kind: input, shape index: {}]   ;;  %s3769_s4 = inlined_call_operand.vmem [shape: f32[1,128], index: 4, kind: input, shape index: {}]   ;;  %s3770_s5 = inlined_call_operand.vmem [shape: f32[8,128], index: 5, kind: output, shape index: {}]  }
   0x1   :  { %v21_v0 = vld [vmem:[%s3765_s1 + $0x8] sm:$0xff]  ;;  %v20_v2 = vld [vmem:[%s3765_s1] sm:$0xff]  ;;  %v23_v18 = vld [vmem:[%s3765_s1 + $0x18] sm:$0xff]  ;;  %vm151_vm4 = vcmask 1045509   ;;  %vm154_vm5 = vcmask 1046534   ;;  %vm157_vm6 = vcmask 1047559  }
   0x2   :  { %v25_v1 = vld [vmem:[%s3765_s1 + $0x28] sm:$0xff]  ;;  %v24_v4 = vld [vmem:[%s3765_s1 + $0x20] sm:$0xff]  ;;  %v27_v19 = vld [vmem:[%s3765_s1 + $0x38] sm:$0xff]  ;;  %vm159_vm7 = vcmask 261120   ;;  %vm2702_vm8 = vmmov 0  }
   0x3   :  { %v2742_v3 = vpack.c.bf16 %v25_v1, %v21_v0  ;;  %v29_v5 = vld [vmem:[%s3765_s1 + $0x48] sm:$0xff]  ;;  %v2753_v7 = vpack.c.bf16 %v24_v4, %v20_v2  ;;  %v28_v9 = vld [vmem:[%s3765_s1 + $0x40] sm:$0xff]  ;;  %v2794_v21 = vpack.c.bf16 %v27_v19, %v23_v18  ;;  %v22_v22 = vld [vmem:[%s3765_s1 + $0x10] sm:$0xff] }
   0x4   :  { %v33_v6 = vld [vmem:[%s3765_s1 + $0x68] sm:$0xff]  ;;  %v32_v10 = vld [vmem:[%s3765_s1 + $0x60] sm:$0xff]  ;;  %v26_v23 = vld [vmem:[%s3765_s1 + $0x30] sm:$0xff] }
   0x5   :  { %v2755_v8 = vpack.c.bf16 %v33_v6, %v29_v5  ;;  %v37_v11 = vld [vmem:[%s3765_s1 + $0x88] sm:$0xff]  ;;  %1906 = vmatprep.subr.bf16.mxu0 %v2742_v3  ;;  %v2771_v13 = vpack.c.bf16 %v32_v10, %v28_v9  ;;  %v36_v14 = vld [vmem:[%s3765_s1 + $0x80] sm:$0xff]  ;;  %3774 = vst [vmem:[#allocation2_spill] sm:$0xff] %v2794_v21  ;;  %v2802_v24 = vpack.c.bf16 %v26_v23, %v22_v22  ;;  %v31_v26 = vld [vmem:[%s3765_s1 + $0x58] sm:$0xff] }
   0x6   :  { %v41_v12 = vld [vmem:[%s3765_s1 + $0xa8] sm:$0xff]  ;;  %1908 = vmatpush1.bf16.msra.mxu0 %v2753_v7  ;;  %v40_v15 = vld [vmem:[%s3765_s1 + $0xa0] sm:$0xff]  ;;  %1946 = vmatprep.subr.bf16.mxu1 %v2794_v21  ;;  %v35_v27 = vld [vmem:[%s3765_s1 + $0x78] sm:$0xff] }
   0x7   :  { %1910 = vmatprep.subr.bf16.mxu0 %v2755_v8  ;;  %v2780_v16 = vpack.c.bf16 %v41_v12, %v37_v11  ;;  %v45_v17 = vld [vmem:[%s3765_s1 + $0xc8] sm:$0xff]  ;;  %v2805_v25 = vpack.c.bf16 %v40_v15, %v36_v14  ;;  %v30_v28 = vld [vmem:[%s3765_s1 + $0x50] sm:$0xff]  ;;  %v44_v30 = vld [vmem:[%s3765_s1 + $0xc0] sm:$0xff]  ;;  %1948 = vmatpush1.bf16.msra.mxu1 %v2802_v24  ;;  %v2827_v32 = vpack.c.bf16 %v35_v27, %v31_v26 }
   0x8   :  { %v49_v20 = vld [vmem:[%s3765_s1 + $0xe8] sm:$0xff]  ;;  %v48_v31 = vld [vmem:[%s3765_s1 + $0xe0] sm:$0xff]  ;;  %v34_v33 = vld [vmem:[%s3765_s1 + $0x70] sm:$0xff] }
   0x9   :  { %v2818_v29 = vpack.c.bf16 %v49_v20, %v45_v17  ;;  %v53_v34 = vld [vmem:[%s3765_s1 + $0x108] sm:$0xff]  ;;  %v2838_v36 = vpack.c.bf16 %v34_v33, %v30_v28  ;;  %v39_v37 = vld [vmem:[%s3765_s1 + $0x98] sm:$0xff]  ;;  %1950 = vmatprep.subr.bf16.mxu1 %v2827_v32  ;;  %v38_v39 = vld [vmem:[%s3765_s1 + $0x90] sm:$0xff]  ;;  %v2854_v41 = vpack.c.bf16 %v48_v31, %v44_v30 }
   0xa   :  { %1912 = vmatpush1.bf16.msra.mxu0 %v2771_v13  ;;  %v57_v35 = vld [vmem:[%s3765_s1 + $0x128] sm:$0xff]  ;;  %v43_v38 = vld [vmem:[%s3765_s1 + $0xb8] sm:$0xff]  ;;  %v42_v40 = vld [vmem:[%s3765_s1 + $0xb0] sm:$0xff] }
   0xb   :  { %1914 = vmatprep.subr.bf16.mxu0 %v2780_v16  ;;  %v52_v42 = vld [vmem:[%s3765_s1 + $0x100] sm:$0xff]  ;;  %v2862_v44 = vpack.c.bf16 %v43_v38, %v39_v37  ;;  %v2865_v45 = vpack.c.bf16 %v57_v35, %v53_v34  ;;  %1952 = vmatpush1.bf16.msra.mxu1 %v2838_v36  ;;  %v61_v46 = vld [vmem:[%s3765_s1 + $0x148] sm:$0xff]  ;;  %v2871_v47 = vpack.c.bf16 %v42_v40, %v38_v39  ;;  %v47_v48 = vld [vmem:[%s3765_s1 + $0xd8] sm:$0xff] }
   0xc   :  { %v56_v43 = vld [vmem:[%s3765_s1 + $0x120] sm:$0xff]  ;;  %v51_v49 = vld [vmem:[%s3765_s1 + $0xf8] sm:$0xff]  ;;  %v65_v50 = vld [vmem:[%s3765_s1 + $0x168] sm:$0xff] }
   0xd   :  { %1954 = vmatprep.subr.bf16.mxu1 %v2862_v44  ;;  %v2883_v51 = vpack.c.bf16 %v51_v49, %v47_v48  ;;  %v46_v52 = vld [vmem:[%s3765_s1 + $0xd0] sm:$0xff]  ;;  %v2892_v54 = vpack.c.bf16 %v56_v43, %v52_v42  ;;  %v55_v55 = vld [vmem:[%s3765_s1 + $0x118] sm:$0xff]  ;;  %v2901_v57 = vpack.c.bf16 %v65_v50, %v61_v46  ;;  %v60_v58 = vld [vmem:[%s3765_s1 + $0x140] sm:$0xff] }
   0xe   :  { %1916 = vmatpush1.bf16.msra.mxu0 %v2805_v25  ;;  %v50_v53 = vld [vmem:[%s3765_s1 + $0xf0] sm:$0xff]  ;;  %v59_v56 = vld [vmem:[%s3765_s1 + $0x138] sm:$0xff]  ;;  %v64_v59 = vld [vmem:[%s3765_s1 + $0x160] sm:$0xff] }
   0xf   :  { %1918 = vmatprep.subr.bf16.mxu0 %v2818_v29  ;;  %1956 = vmatpush1.bf16.msra.mxu1 %v2871_v47  ;;  %v69_v60 = vld [vmem:[%s3765_s1 + $0x188] sm:$0xff]  ;;  %v2913_v61 = vpack.c.bf16 %v50_v53, %v46_v52  ;;  %v2919_v63 = vpack.c.bf16 %v59_v56, %v55_v55  ;;  %v54_v0 = vld [vmem:[%s3765_s1 + $0x110] sm:$0xff]  ;;  %v68_v2 = vld [vmem:[%s3765_s1 + $0x180] sm:$0xff]  ;;  %v2940_v9 = vpack.c.bf16 %v64_v59, %v60_v58 }
  0x10   :  { %v73_v62 = vld [vmem:[%s3765_s1 + $0x1a8] sm:$0xff]  ;;  %1958 = vmatprep.subr.bf16.mxu1 %v2883_v51  ;;  %v58_v1 = vld [vmem:[%s3765_s1 + $0x130] sm:$0xff]  ;;  %v72_v4 = vld [vmem:[%s3765_s1 + $0x1a0] sm:$0xff] }
  0x11   :  { %v63_v5 = vld [vmem:[%s3765_s1 + $0x158] sm:$0xff]  ;;  %v77_v10 = vld [vmem:[%s3765_s1 + $0x1c8] sm:$0xff]  ;;  %v62_v12 = vld [vmem:[%s3765_s1 + $0x150] sm:$0xff]  ;;  %v2952_v14 = vpack.c.bf16 %v73_v62, %v69_v60  ;;  %v2955_v15 = vpack.c.bf16 %v58_v1, %v54_v0  ;;  %v2988_v31 = vpack.c.bf16 %v72_v4, %v68_v2 }
  0x12   :  { %1920 = vmatpush1.bf16.msra.mxu0 %v2854_v41  ;;  %v67_v6 = vld [vmem:[%s3765_s1 + $0x178] sm:$0xff]  ;;  %v81_v11 = vld [vmem:[%s3765_s1 + $0x1e8] sm:$0xff]  ;;  %v66_v17 = vld [vmem:[%s3765_s1 + $0x170] sm:$0xff] }
  0x13   :  { %1922 = vmatprep.subr.bf16.mxu0 %v2865_v45  ;;  %1960 = vmatpush1.bf16.msra.mxu1 %v2913_v61  ;;  %v71_v18 = vld [vmem:[%s3765_s1 + $0x198] sm:$0xff]  ;;  %v2967_v20 = vpack.c.bf16 %v67_v6, %v63_v5  ;;  %v122_v22 = vld [vmem:[%s3766_s0] sm:$0x1]  ;;  %v123_v23 = vld [vmem:[%s3766_s0 + $0x8] sm:$0x1]  ;;  %v2994_v37 = vpack.c.bf16 %v81_v11, %v77_v10  ;;  %v3003_v40 = vpack.c.bf16 %v66_v17, %v62_v12 }
  0x14   :  { %v75_v19 = vld [vmem:[%s3765_s1 + $0x1b8] sm:$0xff]  ;;  %1962 = vmatprep.subr.bf16.mxu1 %v2919_v63  ;;  %v124_v26 = vld [vmem:[%s3766_s0 + $0x10] sm:$0x1]  ;;  %v126_v28 = vld [vmem:[%s3766_s0 + $0x20] sm:$0x1]  ;;  %v138_v34 = vrot.slane %v123_v23, 7 }
  0x15   :  { %v125_v27 = vld [vmem:[%s3766_s0 + $0x18] sm:$0x1]  ;;  %v127_v30 = vld [vmem:[%s3766_s0 + $0x28] sm:$0x1]  ;;  %v128_v33 = vld [vmem:[%s3766_s0 + $0x30] sm:$0x1]  ;;  %v3015_v50 = vpack.c.bf16 %v75_v19, %v71_v18 }
  0x16   :  { %1924 = vmatpush1.bf16.msra.mxu0 %v2892_v54  ;;  %v141_v35 = vrot.slane %v124_v26, 6  ;;  %v76_v38 = vld [vmem:[%s3765_s1 + $0x1c0] sm:$0xff]  ;;  %v129_v42 = vld [vmem:[%s3766_s0 + $0x38] sm:$0x1]  ;;  %v144_v43 = vrot.slane %v125_v27, 5  ;;  %v147_v46 = vrot.slane %v126_v28, 4  ;;  %v140_v52 = vsel %vm139_vm0, %v138_v34, %v122_v22 }
  0x17   :  { %1926 = vmatprep.subr.bf16.mxu0 %v2901_v57  ;;  %v80_v39 = vld [vmem:[%s3765_s1 + $0x1e0] sm:$0xff]  ;;  %1964 = vmatpush1.bf16.msra.mxu1 %v2955_v15  ;;  %v85_v48 = vld [vmem:[%s3765_s1 + $0x208] sm:$0xff]  ;;  %v150_v53 = vrot.slane %v127_v30, 3  ;;  %v153_v56 = vrot.slane %v128_v33, 2  ;;  %v70_v58 = vld [vmem:[%s3765_s1 + $0x190] sm:$0xff]  ;;  %v156_v0 = vrot.slane %v129_v42, 1 }
  0x18   :  { %v89_v49 = vld [vmem:[%s3765_s1 + $0x228] sm:$0xff]  ;;  %1966 = vmatprep.subr.bf16.mxu1 %v2967_v20  ;;  %v143_v55 = vsel %vm142_vm1, %v141_v35, %v140_v52  ;;  %v74_v59 = vld [vmem:[%s3765_s1 + $0x1b0] sm:$0xff]  ;;  %v3026_v60 = vpack.c.bf16 %v80_v39, %v76_v38  ;;  %v79_v1 = vld [vmem:[%s3765_s1 + $0x1d8] sm:$0xff] }
  0x19   :  { %v146_v62 = vsel %vm145_vm2, %v144_v43, %v143_v55  ;;  %v83_v2 = vld [vmem:[%s3765_s1 + $0x1f8] sm:$0xff]  ;;  %v3036_v4 = vpack.c.bf16 %v89_v49, %v85_v48  ;;  %v84_v5 = vld [vmem:[%s3765_s1 + $0x200] sm:$0xff]  ;;  %v93_v11 = vld [vmem:[%s3765_s1 + $0x248] sm:$0xff]  ;;  %v3054_v18 = vpack.c.bf16 %v74_v59, %v70_v58 }
  0x1a   :  { %1928 = vmatpush1.bf16.msra.mxu0 %v2940_v9  ;;  %v88_v6 = vld [vmem:[%s3765_s1 + $0x220] sm:$0xff]  ;;  %v149_v10 = vsel %vm148_vm3, %v147_v46, %v146_v62  ;;  %v97_v12 = vld [vmem:[%s3765_s1 + $0x268] sm:$0xff]  ;;  %v3057_v22 = vpack.c.bf16 %v83_v2, %v79_v1  ;;  %v78_v23 = vld [vmem:[%s3765_s1 + $0x1d0] sm:$0xff]  ;;  %v3771_v62 = vmov 0.0  }
  0x1b   :  { %1930 = vmatprep.subr.bf16.mxu0 %v2952_v14  ;;  %1968 = vmatpush1.bf16.msra.mxu1 %v3003_v40  ;;  %v152_v17 = vsel %vm151_vm4, %v150_v53, %v149_v10  ;;  %v82_v26 = vld [vmem:[%s3765_s1 + $0x1f0] sm:$0xff]  ;;  %v3066_v27 = vpack.c.bf16 %v88_v6, %v84_v5  ;;  %v87_v30 = vld [vmem:[%s3765_s1 + $0x218] sm:$0xff]  ;;  %v3076_v34 = vpack.c.bf16 %v97_v12, %v93_v11  ;;  %v92_v35 = vld [vmem:[%s3765_s1 + $0x240] sm:$0xff] }
  0x1c   :  { %1970 = vmatprep.subr.bf16.mxu1 %v3015_v50  ;;  %v155_v19 = vsel %vm154_vm5, %v153_v56, %v152_v17  ;;  %v91_v33 = vld [vmem:[%s3765_s1 + $0x238] sm:$0xff]  ;;  %v96_v38 = vld [vmem:[%s3765_s1 + $0x260] sm:$0xff]  ;;  %v3086_v39 = vpack.c.bf16 %v82_v26, %v78_v23  ;;  %v86_v43 = vld [vmem:[%s3765_s1 + $0x210] sm:$0xff] }
  0x1d   :  { %v158_v28 = vsel %vm157_vm6, %v156_v0, %v155_v19  ;;  %v3090_v42 = vpack.c.bf16 %v91_v33, %v87_v30  ;;  %v90_v46 = vld [vmem:[%s3765_s1 + $0x230] sm:$0xff]  ;;  %v3099_v48 = vpack.c.bf16 %v96_v38, %v92_v35  ;;  %v95_v49 = vld [vmem:[%s3765_s1 + $0x258] sm:$0xff]  ;;  %v328_v0 = vld [vmem:[%s3766_s0 + $0x1] sm:$0x1] }
  0x1e   :  { %1932 = vmatpush1.bf16.msra.mxu0 %v2988_v31  ;;  %1812 = vmatprep.mubr.msk.f32.mxu0 %vm159_vm7, %v158_v28  ;;  %v99_v52 = vld [vmem:[%s3765_s1 + $0x278] sm:$0xff]  ;;  %v3109_v53 = vpack.c.bf16 %v90_v46, %v86_v43  ;;  %v94_v56 = vld [vmem:[%s3765_s1 + $0x250] sm:$0xff]  ;;  %v329_v1 = vld [vmem:[%s3766_s0 + $0x9] sm:$0x1] }
  0x1f   :  { %1934 = vmatprep.subr.bf16.mxu0 %v2994_v37  ;;  %1972 = vmatpush1.bf16.msra.mxu1 %v3054_v18  ;;  %v3112_v55 = vpack.c.bf16 %v99_v52, %v95_v49  ;;  %v98_v58 = vld [vmem:[%s3765_s1 + $0x270] sm:$0xff]  ;;  %v331_v5 = vld [vmem:[%s3766_s0 + $0x19] sm:$0x1]  ;;  %v332_v6 = vld [vmem:[%s3766_s0 + $0x21] sm:$0x1]  ;;  %v344_v12 = vrot.slane %v329_v1, 7 }
  0x20   :  { %1813 = vmatprep.mubr.msk.f32.mxu1 %vm159_vm7, %v158_v28  ;;  %1974 = vmatprep.subr.bf16.mxu1 %v3057_v22  ;;  %v3123_v59 = vpack.c.bf16 %v98_v58, %v94_v56  ;;  %v330_v2 = vld [vmem:[%s3766_s0 + $0x11] sm:$0x1]  ;;  %v333_v10 = vld [vmem:[%s3766_s0 + $0x29] sm:$0x1]  ;;  %v335_v19 = vld [vmem:[%s3766_s0 + $0x39] sm:$0x1]  ;;  %v102_v58 = vlaneseq }
  0x21   :  { %v334_v11 = vld [vmem:[%s3766_s0 + $0x31] sm:$0x1]  ;;  %v346_v17 = vrot.slane %v330_v2, 6  ;;  %v348_v23 = vrot.slane %v331_v5, 5  ;;  %v350_v26 = vrot.slane %v332_v6, 4  ;;  %v345_v28 = vsel %vm139_vm0, %v344_v12, %v328_v0 }
  0x22   :  { %1936 = vmatpush1.bf16.msra.mxu0 %v3026_v60  ;;  %v352_v30 = vrot.slane %v333_v10, 3  ;;  %v354_v35 = vrot.slane %v334_v11, 2  ;;  %v356_v43 = vrot.slane %v335_v19, 1  ;;  %v103_v0 = vshrl.u32 %v102_v58, 7  ;;  %v100_v2 = vld [vmem:[%s3767_s2] sm:$0xf] }
  0x23   :  { %1938 = vmatprep.subr.bf16.mxu0 %v3036_v4  ;;  %1976 = vmatpush1.bf16.msra.mxu1 %v3086_v39  ;;  %v347_v33 = vsel %vm142_vm1, %v346_v17, %v345_v28 }
  0x24   :  { %1978 = vmatprep.subr.bf16.mxu1 %v3090_v42  ;;  %v349_v38 = vsel %vm145_vm2, %v348_v23, %v347_v33  ;;  %v104_v1 = vsub.s32 0, %v103_v0  ;;  %v108_v5 = vsub.s32 1, %v103_v0  ;;  %v116_v12 = vsub.s32 3, %v103_v0 }
  0x25   :  { %v351_v46 = vsel %vm148_vm3, %v350_v26, %v349_v38 }
  0x26   :  { %1940 = vmatpush1.bf16.msra.mxu0 %v3066_v27  ;;  %v353_v49 = vsel %vm151_vm4, %v352_v30, %v351_v46  ;;  %v3206_v6 = vrot.slane %v100_v2, %v104_v1  ;;  %v3208_v10 = vrot.slane %v100_v2, %v108_v5  ;;  %v112_v30 = vsub.s32 2, %v103_v0 }
  0x27   :  { %1942 = vmatprep.subr.bf16.mxu0 %v3076_v34  ;;  %1980 = vmatpush1.bf16.msra.mxu1 %v3109_v53  ;;  %v355_v52 = vsel %vm154_vm5, %v354_v35, %v353_v49  ;;  %v3212_v33 = vrot.slane %v100_v2, %v116_v12 }
  0x28   :  { %1982 = vmatprep.subr.bf16.mxu1 %v3112_v55  ;;  %v357_v56 = vsel %vm157_vm6, %v356_v43, %v355_v52  ;;  %v3214_v43 = vrot.slane %v100_v2, %v112_v30 }
  0x2a   :  { %1944 = vmatpush1.bf16.msra.mxu0 %v3099_v48 }
  0x2b   :  { %1986 = vmatprep.subr.bf16.mxu0 %v2742_v3  ;;  %1984 = vmatpush1.bf16.msra.mxu1 %v3123_v59 }
  0x2c   :  { %2026 = vmatprep.subr.bf16.mxu1 %v2794_v21 }
  0x2d   :  { %227 = vmatmul.mubr.f32.vlgmr.msra.gmra.mrb[0].mxu0 %v3771_v62 }
  0x2e   :  { %1988 = vmatpush1.bf16.msra.mxu0 %v2753_v7  ;;  %298 = vmatmul.mubr.f32.vlgmr.msra.gmra.mrb[0].mxu1 %v3771_v62 }
  0x2f   :  { %1990 = vmatprep.subr.bf16.mxu0 %v2755_v8  ;;  %2028 = vmatpush1.bf16.msra.mxu1 %v2802_v24 }
  0x30   :  { %2030 = vmatprep.subr.bf16.mxu1 %v2827_v32  ;;  %1817 = vmatprep.mubr.msk.f32.mxu0 %vm159_vm7, %v357_v56 }
  0x31   :  { %1818 = vmatprep.mubr.msk.f32.mxu1 %vm159_vm7, %v357_v56 }
  0x32   :  { %1992 = vmatpush1.bf16.msra.mxu0 %v2771_v13 }
  0x33   :  { %1994 = vmatprep.subr.bf16.mxu0 %v2780_v16  ;;  %2032 = vmatpush1.bf16.msra.mxu1 %v2838_v36 }
  0x34   :  { %2034 = vmatprep.subr.bf16.mxu1 %v2862_v44 }
  0x36   :  { %1996 = vmatpush1.bf16.msra.mxu0 %v2805_v25 }
  0x37   :  { %1998 = vmatprep.subr.bf16.mxu0 %v2818_v29  ;;  %2036 = vmatpush1.bf16.msra.mxu1 %v2871_v47 }
  0x38   :  { %2038 = vmatprep.subr.bf16.mxu1 %v2883_v51 }
  0x3a   :  { %2000 = vmatpush1.bf16.msra.mxu0 %v2854_v41 }
  0x3b   :  { %2002 = vmatprep.subr.bf16.mxu0 %v2865_v45  ;;  %2040 = vmatpush1.bf16.msra.mxu1 %v2913_v61 }
  0x3c   :  { %2042 = vmatprep.subr.bf16.mxu1 %v2919_v63 }
  0x3e   :  { %2004 = vmatpush1.bf16.msra.mxu0 %v2892_v54 }
  0x3f   :  { %2006 = vmatprep.subr.bf16.mxu0 %v2901_v57  ;;  %2044 = vmatpush1.bf16.msra.mxu1 %v2955_v15 }
  0x40   :  { %2046 = vmatprep.subr.bf16.mxu1 %v2967_v20 }
  0x42   :  { %2008 = vmatpush1.bf16.msra.mxu0 %v2940_v9 }
  0x43   :  { %2010 = vmatprep.subr.bf16.mxu0 %v2952_v14  ;;  %2048 = vmatpush1.bf16.msra.mxu1 %v3003_v40 }
  0x44   :  { %2050 = vmatprep.subr.bf16.mxu1 %v3015_v50 }
  0x46   :  { %2012 = vmatpush1.bf16.msra.mxu0 %v2988_v31 }
  0x47   :  { %2014 = vmatprep.subr.bf16.mxu0 %v2994_v37  ;;  %2052 = vmatpush1.bf16.msra.mxu1 %v3054_v18 }
  0x48   :  { %2054 = vmatprep.subr.bf16.mxu1 %v3057_v22 }
  0x4a   :  { %2016 = vmatpush1.bf16.msra.mxu0 %v3026_v60 }
  0x4b   :  { %2018 = vmatprep.subr.bf16.mxu0 %v3036_v4  ;;  %2056 = vmatpush1.bf16.msra.mxu1 %v3086_v39 }
  0x4c   :  { %2058 = vmatprep.subr.bf16.mxu1 %v3090_v42 }
  0x4e   :  { %2020 = vmatpush1.bf16.msra.mxu0 %v3066_v27 }
  0x4f   :  { %2022 = vmatprep.subr.bf16.mxu0 %v3076_v34  ;;  %2060 = vmatpush1.bf16.msra.mxu1 %v3109_v53 }
  0x50   :  { %2062 = vmatprep.subr.bf16.mxu1 %v3112_v55 }
  0x52   :  { %2024 = vmatpush1.bf16.msra.mxu0 %v3099_v48 }
  0x53   :  { %2066 = vmatprep.subr.bf16.mxu0 %v2742_v3  ;;  %2064 = vmatpush1.bf16.msra.mxu1 %v3123_v59 }
  0x54   :  { %2106 = vmatprep.subr.bf16.mxu1 %v2794_v21 }
 0x100   :  { %v228_v11 = vpop.f32.mrb[0].mxu0 }
 0x101   :  { %v229_v17 = vadd.f32 %v228_v11, %v3206_v6  ;;  %v230_v19 = vpop.f32.mrb[1].mxu0  ;;  %v299_v35 = vpop.f32.mrb[0].mxu1 }
 0x102   :  { %v231_v23 = vadd.f32 %v230_v19, %v3208_v10  ;;  %v301_v38 = vpop.f32.mrb[1].mxu1  ;;  %v300_v52 = vadd.f32 %v299_v35, %v3214_v43 }
 0x103   :  { %v1814_v26 = vmul.f32 -1.442695, %v229_v17  ;;  %v302_v46 = vadd.f32 %v301_v38, %v3212_v33  ;;  %v526_v38 = vld [vmem:[%s3766_s0 + $0x2] sm:$0x1] }
 0x104   :  { %v1815_v28 = vmul.f32 -1.442695, %v231_v23 }
 0x105   :  { %2572 = vpow2.f32 %v1814_v26  ;;  %v1816_v49 = vmul.f32 -1.442695, %v302_v46  ;;  %v527_v46 = vld [vmem:[%s3766_s0 + $0xa] sm:$0x1] }
 0x106   :  { %2574 = vpow2.f32 %v1815_v28 }
 0x107   :  { %2576 = vpow2.f32 %v1816_v49  ;;  %v528_v49 = vld [vmem:[%s3766_s0 + $0x12] sm:$0x1] }
 0x108   :  { %2578 = vtanh.f32 %v300_v52  ;;  %v529_v52 = vld [vmem:[%s3766_s0 + $0x1a] sm:$0x1] }
 0x10f   :  { %v2573_v56 = vpop.eup %2572 }
 0x110   :  { %v2575_v58 = vpop.eup %2574  ;;  %v307_v1 = vadd.f32 1.0, %v2573_v56  ;;  %v530_v56 = vld [vmem:[%s3766_s0 + $0x22] sm:$0x1] }
 0x111   :  { %v313_v5 = vadd.f32 1.0, %v2575_v58  ;;  %v2577_v0 = vpop.eup %2576  ;;  %v531_v58 = vld [vmem:[%s3766_s0 + $0x2a] sm:$0x1] }
 0x112   :  { %2580 = vrcp.f32 %v307_v1  ;;  %v2579_v11 = vpop.eup %2578  ;;  %v320_v17 = vadd.f32 1.0, %v2577_v0  ;;  %v532_v1 = vld [vmem:[%s3766_s0 + $0x32] sm:$0x1]  ;;  %v544_v0 = vrot.slane %v528_v49, 6 }
 0x113   :  { %2582 = vrcp.f32 %v313_v5  ;;  %v542_v5 = vrot.slane %v527_v46, 7 }
 0x114   :  { %2584 = vrcp.f32 %v320_v17  ;;  %v548_v17 = vrot.slane %v530_v56, 4 }
 0x11c   :  { %v2581_v12 = vpop.eup %2580 }
 0x11d   :  { %v2583_v19 = vpop.eup %2582  ;;  %v324_v2 = vmul.f32 %v2581_v12, %v2579_v11  ;;  %v533_v11 = vld [vmem:[%s3766_s0 + $0x3a] sm:$0x1]  ;;  %v546_v12 = vrot.slane %v529_v52, 5 }
 0x11e   :  { %v323_v23 = vmul.f32 0.0, %v2583_v19  ;;  %v2585_v28 = vpop.eup %2584  ;;  %v543_v19 = vsel %vm139_vm0, %v542_v5, %v526_v38 }
 0x120   :  { %v3218_v26 = vadd.f32 %v324_v2, %v323_v23  ;;  %v550_v2 = vrot.slane %v531_v58, 3  ;;  %v545_v23 = vsel %vm142_vm1, %v544_v0, %v543_v19 }
 0x122   :  { %2586 = vtanh.f32 %v3218_v26 }
 0x12c   :  { %v2587_v30 = vpop.eup %2586 }
 0x12d   :  { %v327_v35 = vmul.f32 %v2587_v30, %v2585_v28  ;;  %v552_v28 = vrot.slane %v532_v1, 2  ;;  %v547_v30 = vsel %vm145_vm2, %v546_v12, %v545_v23 }
 0x12e   :  { %v549_v62 = vsel %vm148_vm3, %v548_v17, %v547_v30 }
 0x12f   :  { %425 = vmatmul.mubr.f32.vlgmr.msra.gmra.mrb[2].mxu0 %v327_v35  ;;  %496 = vmatmul.mubr.f32.vlgmr.msra.gmra.mrb[2].mxu1 %v327_v35  ;;  %v554_v35 = vrot.slane %v533_v11, 1  ;;  %v551_v46 = vsel %vm151_vm4, %v550_v2, %v549_v62 }
 0x130   :  { %2068 = vmatpush1.bf16.msra.mxu0 %v2753_v7  ;;  %2108 = vmatpush1.bf16.msra.mxu1 %v2802_v24  ;;  %v553_v49 = vsel %vm154_vm5, %v552_v28, %v551_v46 }
 0x131   :  { %2070 = vmatprep.subr.bf16.mxu0 %v2755_v8  ;;  %2110 = vmatprep.subr.bf16.mxu1 %v2827_v32 }
 0x134   :  { %2072 = vmatpush1.bf16.msra.mxu0 %v2771_v13  ;;  %2112 = vmatpush1.bf16.msra.mxu1 %v2838_v36 }
 0x135   :  { %2074 = vmatprep.subr.bf16.mxu0 %v2780_v16  ;;  %2114 = vmatprep.subr.bf16.mxu1 %v2862_v44 }
 0x138   :  { %2076 = vmatpush1.bf16.msra.mxu0 %v2805_v25  ;;  %2116 = vmatpush1.bf16.msra.mxu1 %v2871_v47 }
 0x139   :  { %2078 = vmatprep.subr.bf16.mxu0 %v2818_v29  ;;  %2118 = vmatprep.subr.bf16.mxu1 %v2883_v51 }
 0x13c   :  { %2080 = vmatpush1.bf16.msra.mxu0 %v2854_v41  ;;  %2120 = vmatpush1.bf16.msra.mxu1 %v2913_v61 }
 0x13d   :  { %2082 = vmatprep.subr.bf16.mxu0 %v2865_v45  ;;  %2122 = vmatprep.subr.bf16.mxu1 %v2919_v63 }
 0x140   :  { %2084 = vmatpush1.bf16.msra.mxu0 %v2892_v54  ;;  %2124 = vmatpush1.bf16.msra.mxu1 %v2955_v15 }
 0x141   :  { %2086 = vmatprep.subr.bf16.mxu0 %v2901_v57  ;;  %2126 = vmatprep.subr.bf16.mxu1 %v2967_v20 }
 0x144   :  { %2088 = vmatpush1.bf16.msra.mxu0 %v2940_v9  ;;  %2128 = vmatpush1.bf16.msra.mxu1 %v3003_v40 }
 0x145   :  { %2090 = vmatprep.subr.bf16.mxu0 %v2952_v14  ;;  %2130 = vmatprep.subr.bf16.mxu1 %v3015_v50 }
 0x148   :  { %2092 = vmatpush1.bf16.msra.mxu0 %v2988_v31  ;;  %2132 = vmatpush1.bf16.msra.mxu1 %v3054_v18 }
 0x149   :  { %2094 = vmatprep.subr.bf16.mxu0 %v2994_v37  ;;  %2134 = vmatprep.subr.bf16.mxu1 %v3057_v22 }
 0x14c   :  { %2096 = vmatpush1.bf16.msra.mxu0 %v3026_v60  ;;  %2136 = vmatpush1.bf16.msra.mxu1 %v3086_v39 }
 0x14d   :  { %2098 = vmatprep.subr.bf16.mxu0 %v3036_v4  ;;  %2138 = vmatprep.subr.bf16.mxu1 %v3090_v42 }
 0x150   :  { %2100 = vmatpush1.bf16.msra.mxu0 %v3066_v27  ;;  %2140 = vmatpush1.bf16.msra.mxu1 %v3109_v53 }
 0x151   :  { %2102 = vmatprep.subr.bf16.mxu0 %v3076_v34  ;;  %2142 = vmatprep.subr.bf16.mxu1 %v3112_v55 }
 0x154   :  { %2104 = vmatpush1.bf16.msra.mxu0 %v3099_v48  ;;  %2144 = vmatpush1.bf16.msra.mxu1 %v3123_v59 }
 0x155   :  { %2146 = vmatprep.subr.bf16.mxu0 %v2742_v3  ;;  %2186 = vmatprep.subr.bf16.mxu1 %v2794_v21  ;;  %v555_v21 = vsel %vm157_vm6, %v554_v35, %v553_v49 }
 0x156   :  { %1822 = vmatprep.mubr.msk.f32.mxu0 %vm159_vm7, %v555_v21  ;;  %1823 = vmatprep.mubr.msk.f32.mxu1 %vm159_vm7, %v555_v21 }
 0x202   :  { %v426_v38 = vpop.f32.mrb[2].mxu0  ;;  %v497_v52 = vpop.f32.mrb[2].mxu1 }
 0x203   :  { %v427_v56 = vadd.f32 %v426_v38, %v3206_v6  ;;  %v428_v58 = vpop.f32.mrb[3].mxu0  ;;  %v499_v1 = vpop.f32.mrb[3].mxu1  ;;  %v498_v17 = vadd.f32 %v497_v52, %v3214_v43 }
 0x204   :  { %v429_v5 = vadd.f32 %v428_v58, %v3208_v10  ;;  %v500_v62 = vadd.f32 %v499_v1, %v3212_v33 }
 0x205   :  { %v1819_v0 = vmul.f32 -1.442695, %v427_v56 }
 0x206   :  { %v1820_v11 = vmul.f32 -1.442695, %v429_v5  ;;  %v1821_v12 = vmul.f32 -1.442695, %v500_v62  ;;  %v726_v62 = vld [vmem:[%s3766_s0 + $0x13] sm:$0x1] }
 0x207   :  { %2588 = vpow2.f32 %v1819_v0  ;;  %v724_v0 = vld [vmem:[%s3766_s0 + $0x3] sm:$0x1] }
 0x208   :  { %2590 = vpow2.f32 %v1820_v11  ;;  %v725_v11 = vld [vmem:[%s3766_s0 + $0xb] sm:$0x1] }
 0x209   :  { %2592 = vpow2.f32 %v1821_v12  ;;  %v727_v12 = vld [vmem:[%s3766_s0 + $0x1b] sm:$0x1] }
 0x20a   :  { %2594 = vtanh.f32 %v498_v17  ;;  %v728_v17 = vld [vmem:[%s3766_s0 + $0x23] sm:$0x1] }
 0x211   :  { %v2589_v19 = vpop.eup %2588 }
 0x212   :  { %v2591_v2 = vpop.eup %2590  ;;  %v505_v21 = vadd.f32 1.0, %v2589_v19  ;;  %v729_v19 = vld [vmem:[%s3766_s0 + $0x2b] sm:$0x1] }
 0x213   :  { %v511_v23 = vadd.f32 1.0, %v2591_v2  ;;  %v2593_v28 = vpop.eup %2592  ;;  %v730_v2 = vld [vmem:[%s3766_s0 + $0x33] sm:$0x1] }
 0x214   :  { %2596 = vrcp.f32 %v505_v21  ;;  %v2595_v30 = vpop.eup %2594  ;;  %v518_v38 = vadd.f32 1.0, %v2593_v28  ;;  %v740_v21 = vrot.slane %v725_v11, 7  ;;  %v731_v28 = vld [vmem:[%s3766_s0 + $0x3b] sm:$0x1] }
 0x215   :  { %2598 = vrcp.f32 %v511_v23  ;;  %v742_v23 = vrot.slane %v726_v62, 6 }
 0x216   :  { %2600 = vrcp.f32 %v518_v38 }
 0x21e   :  { %v2597_v35 = vpop.eup %2596 }
 0x21f   :  { %v2599_v46 = vpop.eup %2598  ;;  %v522_v49 = vmul.f32 %v2597_v35, %v2595_v30  ;;  %v744_v30 = vrot.slane %v727_v12, 5  ;;  %v746_v35 = vrot.slane %v728_v17, 4 }
 0x220   :  { %v521_v56 = vmul.f32 %v2599_v46, %v3218_v26  ;;  %v2601_v52 = vpop.eup %2600  ;;  %v3775_v26 = vld [vmem:[#allocation2_spill] sm:$0xff]  ;;  %v741_v46 = vsel %vm139_vm0, %v740_v21, %v724_v0 }
 0x221   :  { %v743_v38 = vsel %vm142_vm1, %v742_v23, %v741_v46 }
 0x222   :  { %v3299_v58 = vadd.f32 %v522_v49, %v521_v56  ;;  %v748_v49 = vrot.slane %v729_v19, 3  ;;  %v750_v56 = vrot.slane %v730_v2, 2 }
 0x224   :  { %2602 = vtanh.f32 %v3299_v58 }
 0x22e   :  { %v2603_v1 = vpop.eup %2602 }
 0x22f   :  { %v525_v5 = vmul.f32 %v2603_v1, %v2601_v52  ;;  %v745_v52 = vsel %vm145_vm2, %v744_v30, %v743_v38  ;;  %v752_v1 = vrot.slane %v731_v28, 1 }
 0x231   :  { %623 = vmatmul.mubr.f32.vlgmr.msra.gmra.mrb[4].mxu0 %v525_v5  ;;  %694 = vmatmul.mubr.f32.vlgmr.msra.gmra.mrb[4].mxu1 %v525_v5  ;;  %v747_v5 = vsel %vm148_vm3, %v746_v35, %v745_v52 }
 0x232   :  { %2148 = vmatpush1.bf16.msra.mxu0 %v2753_v7  ;;  %2188 = vmatpush1.bf16.msra.mxu1 %v2802_v24  ;;  %v749_v11 = vsel %vm151_vm4, %v748_v49, %v747_v5 }
 0x233   :  { %2150 = vmatprep.subr.bf16.mxu0 %v2755_v8  ;;  %2190 = vmatprep.subr.bf16.mxu1 %v2827_v32  ;;  %v751_v62 = vsel %vm154_vm5, %v750_v56, %v749_v11 }
 0x236   :  { %2152 = vmatpush1.bf16.msra.mxu0 %v2771_v13  ;;  %2192 = vmatpush1.bf16.msra.mxu1 %v2838_v36 }
 0x237   :  { %2154 = vmatprep.subr.bf16.mxu0 %v2780_v16  ;;  %2194 = vmatprep.subr.bf16.mxu1 %v2862_v44 }
 0x23a   :  { %2156 = vmatpush1.bf16.msra.mxu0 %v2805_v25  ;;  %2196 = vmatpush1.bf16.msra.mxu1 %v2871_v47 }
 0x23b   :  { %2158 = vmatprep.subr.bf16.mxu0 %v2818_v29  ;;  %2198 = vmatprep.subr.bf16.mxu1 %v2883_v51 }
 0x23e   :  { %2160 = vmatpush1.bf16.msra.mxu0 %v2854_v41  ;;  %2200 = vmatpush1.bf16.msra.mxu1 %v2913_v61 }
 0x23f   :  { %2162 = vmatprep.subr.bf16.mxu0 %v2865_v45  ;;  %2202 = vmatprep.subr.bf16.mxu1 %v2919_v63 }
 0x242   :  { %2164 = vmatpush1.bf16.msra.mxu0 %v2892_v54  ;;  %2204 = vmatpush1.bf16.msra.mxu1 %v2955_v15 }
 0x243   :  { %2166 = vmatprep.subr.bf16.mxu0 %v2901_v57  ;;  %2206 = vmatprep.subr.bf16.mxu1 %v2967_v20 }
 0x246   :  { %2168 = vmatpush1.bf16.msra.mxu0 %v2940_v9  ;;  %2208 = vmatpush1.bf16.msra.mxu1 %v3003_v40 }
 0x247   :  { %2170 = vmatprep.subr.bf16.mxu0 %v2952_v14  ;;  %2210 = vmatprep.subr.bf16.mxu1 %v3015_v50 }
 0x24a   :  { %2172 = vmatpush1.bf16.msra.mxu0 %v2988_v31  ;;  %2212 = vmatpush1.bf16.msra.mxu1 %v3054_v18 }
 0x24b   :  { %2174 = vmatprep.subr.bf16.mxu0 %v2994_v37  ;;  %2214 = vmatprep.subr.bf16.mxu1 %v3057_v22 }
 0x24e   :  { %2176 = vmatpush1.bf16.msra.mxu0 %v3026_v60  ;;  %2216 = vmatpush1.bf16.msra.mxu1 %v3086_v39 }
 0x24f   :  { %2178 = vmatprep.subr.bf16.mxu0 %v3036_v4  ;;  %2218 = vmatprep.subr.bf16.mxu1 %v3090_v42 }
 0x252   :  { %2180 = vmatpush1.bf16.msra.mxu0 %v3066_v27  ;;  %2220 = vmatpush1.bf16.msra.mxu1 %v3109_v53 }
 0x253   :  { %2182 = vmatprep.subr.bf16.mxu0 %v3076_v34  ;;  %2222 = vmatprep.subr.bf16.mxu1 %v3112_v55 }
 0x256   :  { %2184 = vmatpush1.bf16.msra.mxu0 %v3099_v48  ;;  %2224 = vmatpush1.bf16.msra.mxu1 %v3123_v59 }
 0x257   :  { %2226 = vmatprep.subr.bf16.mxu0 %v2742_v3  ;;  %2266 = vmatprep.subr.bf16.mxu1 %v3775_v26  ;;  %v753_v26 = vsel %vm157_vm6, %v752_v1, %v751_v62 }
 0x258   :  { %1827 = vmatprep.mubr.msk.f32.mxu0 %vm159_vm7, %v753_v26  ;;  %1828 = vmatprep.mubr.msk.f32.mxu1 %vm159_vm7, %v753_v26 }
 0x304   :  { %v624_v0 = vpop.f32.mrb[4].mxu0  ;;  %v695_v12 = vpop.f32.mrb[4].mxu1 }
 0x305   :  { %v625_v17 = vadd.f32 %v624_v0, %v3206_v6  ;;  %v626_v19 = vpop.f32.mrb[5].mxu0  ;;  %v697_v2 = vpop.f32.mrb[5].mxu1  ;;  %v696_v46 = vadd.f32 %v695_v12, %v3214_v43 }
 0x306   :  { %v627_v21 = vadd.f32 %v626_v19, %v3208_v10  ;;  %v698_v30 = vadd.f32 %v697_v2, %v3212_v33 }
 0x307   :  { %v1824_v23 = vmul.f32 -1.442695, %v625_v17 }
 0x308   :  { %v1825_v28 = vmul.f32 -1.442695, %v627_v21  ;;  %v1826_v35 = vmul.f32 -1.442695, %v698_v30  ;;  %v924_v30 = vld [vmem:[%s3766_s0 + $0x14] sm:$0x1] }
 0x309   :  { %2604 = vpow2.f32 %v1824_v23  ;;  %v922_v23 = vld [vmem:[%s3766_s0 + $0x4] sm:$0x1] }
 0x30a   :  { %2606 = vpow2.f32 %v1825_v28  ;;  %v923_v28 = vld [vmem:[%s3766_s0 + $0xc] sm:$0x1] }
 0x30b   :  { %2608 = vpow2.f32 %v1826_v35  ;;  %v925_v35 = vld [vmem:[%s3766_s0 + $0x1c] sm:$0x1] }
 0x30c   :  { %2610 = vtanh.f32 %v696_v46  ;;  %v926_v46 = vld [vmem:[%s3766_s0 + $0x24] sm:$0x1] }
 0x313   :  { %v2605_v49 = vpop.eup %2604 }
 0x314   :  { %v2607_v38 = vpop.eup %2606  ;;  %v703_v26 = vadd.f32 1.0, %v2605_v49  ;;  %v927_v49 = vld [vmem:[%s3766_s0 + $0x2c] sm:$0x1] }
 0x315   :  { %v709_v56 = vadd.f32 1.0, %v2607_v38  ;;  %v2609_v52 = vpop.eup %2608  ;;  %v928_v38 = vld [vmem:[%s3766_s0 + $0x34] sm:$0x1] }
 0x316   :  { %2612 = vrcp.f32 %v703_v26  ;;  %v2611_v1 = vpop.eup %2610  ;;  %v716_v0 = vadd.f32 1.0, %v2609_v52  ;;  %v938_v26 = vrot.slane %v923_v28, 7  ;;  %v929_v52 = vld [vmem:[%s3766_s0 + $0x3c] sm:$0x1] }
 0x317   :  { %2614 = vrcp.f32 %v709_v56  ;;  %v940_v56 = vrot.slane %v924_v30, 6 }
 0x318   :  { %2616 = vrcp.f32 %v716_v0 }
 0x320   :  { %v2613_v5 = vpop.eup %2612 }
 0x321   :  { %v2615_v11 = vpop.eup %2614  ;;  %v720_v62 = vmul.f32 %v2613_v5, %v2611_v1  ;;  %v942_v1 = vrot.slane %v925_v35, 5  ;;  %v944_v5 = vrot.slane %v926_v46, 4 }
 0x322   :  { %v719_v17 = vmul.f32 %v2615_v11, %v3299_v58  ;;  %v2617_v12 = vpop.eup %2616  ;;  %v3776_v58 = vld [vmem:[#allocation2_spill] sm:$0xff]  ;;  %v939_v11 = vsel %vm139_vm0, %v938_v26, %v922_v23 }
 0x323   :  { %v941_v0 = vsel %vm142_vm1, %v940_v56, %v939_v11 }
 0x324   :  { %v3380_v19 = vadd.f32 %v720_v62, %v719_v17  ;;  %v946_v62 = vrot.slane %v927_v49, 3  ;;  %v948_v17 = vrot.slane %v928_v38, 2 }
 0x326   :  { %2618 = vtanh.f32 %v3380_v19 }
 0x330   :  { %v2619_v2 = vpop.eup %2618 }
 0x331   :  { %v723_v21 = vmul.f32 %v2619_v2, %v2617_v12  ;;  %v943_v12 = vsel %vm145_vm2, %v942_v1, %v941_v0  ;;  %v950_v2 = vrot.slane %v929_v52, 1 }
 0x333   :  { %821 = vmatmul.mubr.f32.vlgmr.msra.gmra.mrb[6].mxu0 %v723_v21  ;;  %892 = vmatmul.mubr.f32.vlgmr.msra.gmra.mrb[6].mxu1 %v723_v21  ;;  %v945_v21 = vsel %vm148_vm3, %v944_v5, %v943_v12 }
 0x334   :  { %2228 = vmatpush1.bf16.msra.mxu0 %v2753_v7  ;;  %2268 = vmatpush1.bf16.msra.mxu1 %v2802_v24  ;;  %v947_v28 = vsel %vm151_vm4, %v946_v62, %v945_v21 }
 0x335   :  { %2230 = vmatprep.subr.bf16.mxu0 %v2755_v8  ;;  %2270 = vmatprep.subr.bf16.mxu1 %v2827_v32  ;;  %v949_v30 = vsel %vm154_vm5, %v948_v17, %v947_v28 }
 0x338   :  { %2232 = vmatpush1.bf16.msra.mxu0 %v2771_v13  ;;  %2272 = vmatpush1.bf16.msra.mxu1 %v2838_v36 }
 0x339   :  { %2234 = vmatprep.subr.bf16.mxu0 %v2780_v16  ;;  %2274 = vmatprep.subr.bf16.mxu1 %v2862_v44 }
 0x33c   :  { %2236 = vmatpush1.bf16.msra.mxu0 %v2805_v25  ;;  %2276 = vmatpush1.bf16.msra.mxu1 %v2871_v47 }
 0x33d   :  { %2238 = vmatprep.subr.bf16.mxu0 %v2818_v29  ;;  %2278 = vmatprep.subr.bf16.mxu1 %v2883_v51 }
 0x340   :  { %2240 = vmatpush1.bf16.msra.mxu0 %v2854_v41  ;;  %2280 = vmatpush1.bf16.msra.mxu1 %v2913_v61 }
 0x341   :  { %2242 = vmatprep.subr.bf16.mxu0 %v2865_v45  ;;  %2282 = vmatprep.subr.bf16.mxu1 %v2919_v63 }
 0x344   :  { %2244 = vmatpush1.bf16.msra.mxu0 %v2892_v54  ;;  %2284 = vmatpush1.bf16.msra.mxu1 %v2955_v15 }
 0x345   :  { %2246 = vmatprep.subr.bf16.mxu0 %v2901_v57  ;;  %2286 = vmatprep.subr.bf16.mxu1 %v2967_v20 }
 0x348   :  { %2248 = vmatpush1.bf16.msra.mxu0 %v2940_v9  ;;  %2288 = vmatpush1.bf16.msra.mxu1 %v3003_v40 }
 0x349   :  { %2250 = vmatprep.subr.bf16.mxu0 %v2952_v14  ;;  %2290 = vmatprep.subr.bf16.mxu1 %v3015_v50 }
 0x34c   :  { %2252 = vmatpush1.bf16.msra.mxu0 %v2988_v31  ;;  %2292 = vmatpush1.bf16.msra.mxu1 %v3054_v18 }
 0x34d   :  { %2254 = vmatprep.subr.bf16.mxu0 %v2994_v37  ;;  %2294 = vmatprep.subr.bf16.mxu1 %v3057_v22 }
 0x350   :  { %2256 = vmatpush1.bf16.msra.mxu0 %v3026_v60  ;;  %2296 = vmatpush1.bf16.msra.mxu1 %v3086_v39 }
 0x351   :  { %2258 = vmatprep.subr.bf16.mxu0 %v3036_v4  ;;  %2298 = vmatprep.subr.bf16.mxu1 %v3090_v42 }
 0x354   :  { %2260 = vmatpush1.bf16.msra.mxu0 %v3066_v27  ;;  %2300 = vmatpush1.bf16.msra.mxu1 %v3109_v53 }
 0x355   :  { %2262 = vmatprep.subr.bf16.mxu0 %v3076_v34  ;;  %2302 = vmatprep.subr.bf16.mxu1 %v3112_v55 }
 0x358   :  { %2264 = vmatpush1.bf16.msra.mxu0 %v3099_v48  ;;  %2304 = vmatpush1.bf16.msra.mxu1 %v3123_v59 }
 0x359   :  { %2306 = vmatprep.subr.bf16.mxu0 %v2742_v3  ;;  %2346 = vmatprep.subr.bf16.mxu1 %v3776_v58  ;;  %v951_v58 = vsel %vm157_vm6, %v950_v2, %v949_v30 }
 0x35a   :  { %1832 = vmatprep.mubr.msk.f32.mxu0 %vm159_vm7, %v951_v58  ;;  %1833 = vmatprep.mubr.msk.f32.mxu1 %vm159_vm7, %v951_v58 }
 0x406   :  { %v822_v23 = vpop.f32.mrb[6].mxu0  ;;  %v893_v35 = vpop.f32.mrb[6].mxu1 }
 0x407   :  { %v823_v46 = vadd.f32 %v822_v23, %v3206_v6  ;;  %v824_v49 = vpop.f32.mrb[7].mxu0  ;;  %v895_v38 = vpop.f32.mrb[7].mxu1  ;;  %v894_v11 = vadd.f32 %v893_v35, %v3214_v43 }
 0x408   :  { %v825_v26 = vadd.f32 %v824_v49, %v3208_v10  ;;  %v896_v1 = vadd.f32 %v895_v38, %v3212_v33 }
 0x409   :  { %v1829_v56 = vmul.f32 -1.442695, %v823_v46 }
 0x40a   :  { %v1830_v52 = vmul.f32 -1.442695, %v825_v26  ;;  %v1831_v5 = vmul.f32 -1.442695, %v896_v1  ;;  %v1122_v1 = vld [vmem:[%s3766_s0 + $0x15] sm:$0x1] }
 0x40b   :  { %2620 = vpow2.f32 %v1829_v56  ;;  %v1120_v56 = vld [vmem:[%s3766_s0 + $0x5] sm:$0x1] }
 0x40c   :  { %2622 = vpow2.f32 %v1830_v52  ;;  %v1121_v52 = vld [vmem:[%s3766_s0 + $0xd] sm:$0x1] }
 0x40d   :  { %2624 = vpow2.f32 %v1831_v5  ;;  %v1123_v5 = vld [vmem:[%s3766_s0 + $0x1d] sm:$0x1] }
 0x40e   :  { %2626 = vtanh.f32 %v894_v11  ;;  %v1124_v11 = vld [vmem:[%s3766_s0 + $0x25] sm:$0x1] }
 0x415   :  { %v2621_v62 = vpop.eup %2620 }
 0x416   :  { %v2623_v0 = vpop.eup %2622  ;;  %v901_v58 = vadd.f32 1.0, %v2621_v62  ;;  %v1125_v62 = vld [vmem:[%s3766_s0 + $0x2d] sm:$0x1] }
 0x417   :  { %v907_v17 = vadd.f32 1.0, %v2623_v0  ;;  %v2625_v12 = vpop.eup %2624  ;;  %v1126_v0 = vld [vmem:[%s3766_s0 + $0x35] sm:$0x1] }
 0x418   :  { %2628 = vrcp.f32 %v901_v58  ;;  %v2627_v2 = vpop.eup %2626  ;;  %v914_v23 = vadd.f32 1.0, %v2625_v12  ;;  %v1136_v58 = vrot.slane %v1121_v52, 7  ;;  %v1127_v12 = vld [vmem:[%s3766_s0 + $0x3d] sm:$0x1] }
 0x419   :  { %2630 = vrcp.f32 %v907_v17  ;;  %v1138_v17 = vrot.slane %v1122_v1, 6 }
 0x41a   :  { %2632 = vrcp.f32 %v914_v23 }
 0x422   :  { %v2629_v21 = vpop.eup %2628 }
 0x423   :  { %v2631_v28 = vpop.eup %2630  ;;  %v918_v30 = vmul.f32 %v2629_v21, %v2627_v2  ;;  %v1140_v2 = vrot.slane %v1123_v5, 5  ;;  %v1142_v21 = vrot.slane %v1124_v11, 4 }
 0x424   :  { %v917_v46 = vmul.f32 %v2631_v28, %v3380_v19  ;;  %v2633_v35 = vpop.eup %2632  ;;  %v3777_v19 = vld [vmem:[#allocation2_spill] sm:$0xff]  ;;  %v1137_v28 = vsel %vm139_vm0, %v1136_v58, %v1120_v56 }
 0x425   :  { %v1139_v23 = vsel %vm142_vm1, %v1138_v17, %v1137_v28 }
 0x426   :  { %v3461_v49 = vadd.f32 %v918_v30, %v917_v46  ;;  %v1144_v30 = vrot.slane %v1125_v62, 3  ;;  %v1146_v46 = vrot.slane %v1126_v0, 2 }
 0x428   :  { %2634 = vtanh.f32 %v3461_v49 }
 0x432   :  { %v2635_v38 = vpop.eup %2634 }
 0x433   :  { %v921_v26 = vmul.f32 %v2635_v38, %v2633_v35  ;;  %v1141_v35 = vsel %vm145_vm2, %v1140_v2, %v1139_v23  ;;  %v1148_v38 = vrot.slane %v1127_v12, 1 }
 0x435   :  { %1019 = vmatmul.mubr.f32.vlgmr.msra.gmra.mrb[8].mxu0 %v921_v26  ;;  %1090 = vmatmul.mubr.f32.vlgmr.msra.gmra.mrb[8].mxu1 %v921_v26  ;;  %v1143_v26 = vsel %vm148_vm3, %v1142_v21, %v1141_v35 }
 0x436   :  { %2308 = vmatpush1.bf16.msra.mxu0 %v2753_v7  ;;  %2348 = vmatpush1.bf16.msra.mxu1 %v2802_v24  ;;  %v1145_v52 = vsel %vm151_vm4, %v1144_v30, %v1143_v26 }
 0x437   :  { %2310 = vmatprep.subr.bf16.mxu0 %v2755_v8  ;;  %2350 = vmatprep.subr.bf16.mxu1 %v2827_v32  ;;  %v1147_v1 = vsel %vm154_vm5, %v1146_v46, %v1145_v52 }
 0x43a   :  { %2312 = vmatpush1.bf16.msra.mxu0 %v2771_v13  ;;  %2352 = vmatpush1.bf16.msra.mxu1 %v2838_v36 }
 0x43b   :  { %2314 = vmatprep.subr.bf16.mxu0 %v2780_v16  ;;  %2354 = vmatprep.subr.bf16.mxu1 %v2862_v44 }
 0x43e   :  { %2316 = vmatpush1.bf16.msra.mxu0 %v2805_v25  ;;  %2356 = vmatpush1.bf16.msra.mxu1 %v2871_v47 }
 0x43f   :  { %2318 = vmatprep.subr.bf16.mxu0 %v2818_v29  ;;  %2358 = vmatprep.subr.bf16.mxu1 %v2883_v51 }
 0x442   :  { %2320 = vmatpush1.bf16.msra.mxu0 %v2854_v41  ;;  %2360 = vmatpush1.bf16.msra.mxu1 %v2913_v61 }
 0x443   :  { %2322 = vmatprep.subr.bf16.mxu0 %v2865_v45  ;;  %2362 = vmatprep.subr.bf16.mxu1 %v2919_v63 }
 0x446   :  { %2324 = vmatpush1.bf16.msra.mxu0 %v2892_v54  ;;  %2364 = vmatpush1.bf16.msra.mxu1 %v2955_v15 }
 0x447   :  { %2326 = vmatprep.subr.bf16.mxu0 %v2901_v57  ;;  %2366 = vmatprep.subr.bf16.mxu1 %v2967_v20 }
 0x44a   :  { %2328 = vmatpush1.bf16.msra.mxu0 %v2940_v9  ;;  %2368 = vmatpush1.bf16.msra.mxu1 %v3003_v40 }
 0x44b   :  { %2330 = vmatprep.subr.bf16.mxu0 %v2952_v14  ;;  %2370 = vmatprep.subr.bf16.mxu1 %v3015_v50 }
 0x44e   :  { %2332 = vmatpush1.bf16.msra.mxu0 %v2988_v31  ;;  %2372 = vmatpush1.bf16.msra.mxu1 %v3054_v18 }
 0x44f   :  { %2334 = vmatprep.subr.bf16.mxu0 %v2994_v37  ;;  %2374 = vmatprep.subr.bf16.mxu1 %v3057_v22 }
 0x452   :  { %2336 = vmatpush1.bf16.msra.mxu0 %v3026_v60  ;;  %2376 = vmatpush1.bf16.msra.mxu1 %v3086_v39 }
 0x453   :  { %2338 = vmatprep.subr.bf16.mxu0 %v3036_v4  ;;  %2378 = vmatprep.subr.bf16.mxu1 %v3090_v42 }
 0x456   :  { %2340 = vmatpush1.bf16.msra.mxu0 %v3066_v27  ;;  %2380 = vmatpush1.bf16.msra.mxu1 %v3109_v53 }
 0x457   :  { %2342 = vmatprep.subr.bf16.mxu0 %v3076_v34  ;;  %2382 = vmatprep.subr.bf16.mxu1 %v3112_v55 }
 0x45a   :  { %2344 = vmatpush1.bf16.msra.mxu0 %v3099_v48  ;;  %2384 = vmatpush1.bf16.msra.mxu1 %v3123_v59 }
 0x45b   :  { %2386 = vmatprep.subr.bf16.mxu0 %v2742_v3  ;;  %2426 = vmatprep.subr.bf16.mxu1 %v3777_v19  ;;  %v1149_v19 = vsel %vm157_vm6, %v1148_v38, %v1147_v1 }
 0x45c   :  { %1837 = vmatprep.mubr.msk.f32.mxu0 %vm159_vm7, %v1149_v19  ;;  %1838 = vmatprep.mubr.msk.f32.mxu1 %vm159_vm7, %v1149_v19 }
 0x508   :  { %v1020_v56 = vpop.f32.mrb[8].mxu0  ;;  %v1091_v5 = vpop.f32.mrb[8].mxu1 }
 0x509   :  { %v1021_v11 = vadd.f32 %v1020_v56, %v3206_v6  ;;  %v1022_v62 = vpop.f32.mrb[9].mxu0  ;;  %v1093_v0 = vpop.f32.mrb[9].mxu1  ;;  %v1092_v28 = vadd.f32 %v1091_v5, %v3214_v43 }
 0x50a   :  { %v1023_v58 = vadd.f32 %v1022_v62, %v3208_v10  ;;  %v1094_v2 = vadd.f32 %v1093_v0, %v3212_v33 }
 0x50b   :  { %v1834_v17 = vmul.f32 -1.442695, %v1021_v11 }
 0x50c   :  { %v1835_v12 = vmul.f32 -1.442695, %v1023_v58  ;;  %v1836_v21 = vmul.f32 -1.442695, %v1094_v2  ;;  %v1320_v2 = vld [vmem:[%s3766_s0 + $0x16] sm:$0x1] }
 0x50d   :  { %2636 = vpow2.f32 %v1834_v17  ;;  %v1318_v17 = vld [vmem:[%s3766_s0 + $0x6] sm:$0x1] }
 0x50e   :  { %2638 = vpow2.f32 %v1835_v12  ;;  %v1319_v12 = vld [vmem:[%s3766_s0 + $0xe] sm:$0x1] }
 0x50f   :  { %2640 = vpow2.f32 %v1836_v21  ;;  %v1321_v21 = vld [vmem:[%s3766_s0 + $0x1e] sm:$0x1] }
 0x510   :  { %2642 = vtanh.f32 %v1092_v28  ;;  %v1323_v28 = vld [vmem:[%s3766_s0 + $0x2e] sm:$0x1] }
 0x517   :  { %v2637_v30 = vpop.eup %2636 }
 0x518   :  { %v2639_v23 = vpop.eup %2638  ;;  %v1099_v19 = vadd.f32 1.0, %v2637_v30  ;;  %v1324_v30 = vld [vmem:[%s3766_s0 + $0x36] sm:$0x1] }
 0x519   :  { %v1105_v46 = vadd.f32 1.0, %v2639_v23  ;;  %v2641_v35 = vpop.eup %2640  ;;  %v1334_v23 = vrot.slane %v1319_v12, 7 }
 0x51a   :  { %2644 = vrcp.f32 %v1099_v19  ;;  %v2643_v38 = vpop.eup %2642  ;;  %v1112_v56 = vadd.f32 1.0, %v2641_v35  ;;  %v1336_v19 = vrot.slane %v1320_v2, 6  ;;  %v1338_v35 = vrot.slane %v1321_v21, 5 }
 0x51b   :  { %2646 = vrcp.f32 %v1105_v46  ;;  %v1325_v46 = vld [vmem:[%s3766_s0 + $0x3e] sm:$0x1] }
 0x51c   :  { %2648 = vrcp.f32 %v1112_v56  ;;  %v1344_v56 = vrot.slane %v1324_v30, 2 }
 0x524   :  { %v2645_v26 = vpop.eup %2644 }
 0x525   :  { %v2647_v52 = vpop.eup %2646  ;;  %v1116_v1 = vmul.f32 %v2645_v26, %v2643_v38  ;;  %v1335_v26 = vsel %vm139_vm0, %v1334_v23, %v1318_v17 }
 0x526   :  { %v1115_v11 = vmul.f32 %v2647_v52, %v3461_v49  ;;  %v2649_v5 = vpop.eup %2648  ;;  %v3778_v49 = vld [vmem:[#allocation2_spill] sm:$0xff]  ;;  %v1342_v52 = vrot.slane %v1323_v28, 3 }
 0x528   :  { %v3542_v62 = vadd.f32 %v1116_v1, %v1115_v11  ;;  %v1337_v1 = vsel %vm142_vm1, %v1336_v19, %v1335_v26 }
 0x529   :  { %v1339_v11 = vsel %vm145_vm2, %v1338_v35, %v1337_v1 }
 0x52a   :  { %2650 = vtanh.f32 %v3542_v62 }
 0x534   :  { %v2651_v0 = vpop.eup %2650 }
 0x535   :  { %v1119_v58 = vmul.f32 %v2651_v0, %v2649_v5  ;;  %v1346_v5 = vrot.slane %v1325_v46, 1 }
 0x537   :  { %1217 = vmatmul.mubr.f32.vlgmr.msra.gmra.mrb[10].mxu0 %v1119_v58  ;;  %1288 = vmatmul.mubr.f32.vlgmr.msra.gmra.mrb[10].mxu1 %v1119_v58 }
 0x538   :  { %2388 = vmatpush1.bf16.msra.mxu0 %v2753_v7  ;;  %2428 = vmatpush1.bf16.msra.mxu1 %v2802_v24 }
 0x539   :  { %2390 = vmatprep.subr.bf16.mxu0 %v2755_v8  ;;  %2430 = vmatprep.subr.bf16.mxu1 %v2827_v32 }
 0x53c   :  { %2392 = vmatpush1.bf16.msra.mxu0 %v2771_v13  ;;  %2432 = vmatpush1.bf16.msra.mxu1 %v2838_v36 }
 0x53d   :  { %2394 = vmatprep.subr.bf16.mxu0 %v2780_v16  ;;  %2434 = vmatprep.subr.bf16.mxu1 %v2862_v44 }
 0x540   :  { %2396 = vmatpush1.bf16.msra.mxu0 %v2805_v25  ;;  %2436 = vmatpush1.bf16.msra.mxu1 %v2871_v47 }
 0x541   :  { %2398 = vmatprep.subr.bf16.mxu0 %v2818_v29  ;;  %2438 = vmatprep.subr.bf16.mxu1 %v2883_v51 }
 0x544   :  { %2400 = vmatpush1.bf16.msra.mxu0 %v2854_v41  ;;  %2440 = vmatpush1.bf16.msra.mxu1 %v2913_v61 }
 0x545   :  { %2402 = vmatprep.subr.bf16.mxu0 %v2865_v45  ;;  %2442 = vmatprep.subr.bf16.mxu1 %v2919_v63 }
 0x548   :  { %2404 = vmatpush1.bf16.msra.mxu0 %v2892_v54  ;;  %2444 = vmatpush1.bf16.msra.mxu1 %v2955_v15 }
 0x549   :  { %2406 = vmatprep.subr.bf16.mxu0 %v2901_v57  ;;  %2446 = vmatprep.subr.bf16.mxu1 %v2967_v20 }
 0x54c   :  { %2408 = vmatpush1.bf16.msra.mxu0 %v2940_v9  ;;  %2448 = vmatpush1.bf16.msra.mxu1 %v3003_v40 }
 0x54d   :  { %2410 = vmatprep.subr.bf16.mxu0 %v2952_v14  ;;  %2450 = vmatprep.subr.bf16.mxu1 %v3015_v50 }
 0x550   :  { %2412 = vmatpush1.bf16.msra.mxu0 %v2988_v31  ;;  %2452 = vmatpush1.bf16.msra.mxu1 %v3054_v18 }
 0x551   :  { %2414 = vmatprep.subr.bf16.mxu0 %v2994_v37  ;;  %2454 = vmatprep.subr.bf16.mxu1 %v3057_v22 }
 0x554   :  { %2416 = vmatpush1.bf16.msra.mxu0 %v3026_v60  ;;  %2456 = vmatpush1.bf16.msra.mxu1 %v3086_v39 }
 0x555   :  { %2418 = vmatprep.subr.bf16.mxu0 %v3036_v4  ;;  %2458 = vmatprep.subr.bf16.mxu1 %v3090_v42 }
 0x558   :  { %2420 = vmatpush1.bf16.msra.mxu0 %v3066_v27  ;;  %2460 = vmatpush1.bf16.msra.mxu1 %v3109_v53 }
 0x559   :  { %2422 = vmatprep.subr.bf16.mxu0 %v3076_v34  ;;  %2462 = vmatprep.subr.bf16.mxu1 %v3112_v55 }
 0x55c   :  { %2424 = vmatpush1.bf16.msra.mxu0 %v3099_v48  ;;  %2464 = vmatpush1.bf16.msra.mxu1 %v3123_v59 }
 0x55d   :  { %2466 = vmatprep.subr.bf16.mxu0 %v2742_v3  ;;  %2506 = vmatprep.subr.bf16.mxu1 %v3778_v49  ;;  %v1322_v3 = vld [vmem:[%s3766_s0 + $0x26] sm:$0x1] }
 0x55e   :  { %v1340_v38 = vrot.slane %v1322_v3, 4 }
 0x560   :  { %v1341_v0 = vsel %vm148_vm3, %v1340_v38, %v1339_v11 }
 0x561   :  { %v1343_v58 = vsel %vm151_vm4, %v1342_v52, %v1341_v0 }
 0x562   :  { %v1345_v49 = vsel %vm154_vm5, %v1344_v56, %v1343_v58 }
 0x563   :  { %v1347_v12 = vsel %vm157_vm6, %v1346_v5, %v1345_v49 }
 0x564   :  { %1842 = vmatprep.mubr.msk.f32.mxu0 %vm159_vm7, %v1347_v12  ;;  %1843 = vmatprep.mubr.msk.f32.mxu1 %vm159_vm7, %v1347_v12 }
 0x60a   :  { %v1218_v17 = vpop.f32.mrb[10].mxu0  ;;  %v1289_v2 = vpop.f32.mrb[10].mxu1 }
 0x60b   :  { %v1219_v21 = vadd.f32 %v1218_v17, %v3206_v6  ;;  %v1220_v3 = vpop.f32.mrb[11].mxu0  ;;  %v1291_v28 = vpop.f32.mrb[11].mxu1  ;;  %v1290_v38 = vadd.f32 %v1289_v2, %v3214_v43 }
 0x60c   :  { %v1221_v30 = vadd.f32 %v1220_v3, %v3208_v10  ;;  %v1292_v46 = vadd.f32 %v1291_v28, %v3212_v33 }
 0x60d   :  { %v1839_v23 = vmul.f32 -1.442695, %v1219_v21 }
 0x60e   :  { %v1840_v19 = vmul.f32 -1.442695, %v1221_v30  ;;  %v1841_v35 = vmul.f32 -1.442695, %v1292_v46 }
 0x60f   :  { %2652 = vpow2.f32 %v1839_v23 }
 0x610   :  { %2654 = vpow2.f32 %v1840_v19 }
 0x611   :  { %2656 = vpow2.f32 %v1841_v35 }
 0x612   :  { %2658 = vtanh.f32 %v1290_v38 }
 0x619   :  { %v2653_v26 = vpop.eup %2652 }
 0x61a   :  { %v2655_v52 = vpop.eup %2654  ;;  %v1297_v1 = vadd.f32 1.0, %v2653_v26 }
 0x61b   :  { %v1303_v56 = vadd.f32 1.0, %v2655_v52  ;;  %v2657_v11 = vpop.eup %2656 }
 0x61c   :  { %2660 = vrcp.f32 %v1297_v1  ;;  %v2659_v5 = vpop.eup %2658  ;;  %v1310_v12 = vadd.f32 1.0, %v2657_v11  ;;  %v1715_v11 = vld [vmem:[%s3768_s3 + $0x8] sm:$0xff] }
 0x61d   :  { %2662 = vrcp.f32 %v1303_v56  ;;  %v1714_v56 = vld [vmem:[%s3768_s3] sm:$0xff] }
 0x61e   :  { %2664 = vrcp.f32 %v1310_v12 }
 0x626   :  { %v2661_v0 = vpop.eup %2660 }
 0x627   :  { %v2663_v58 = vpop.eup %2662  ;;  %v1314_v49 = vmul.f32 %v2661_v0, %v2659_v5  ;;  %v2546_v5 = vpack.c.bf16 %v1715_v11, %v1714_v56  ;;  %v2701_v0 = vmov 0.0|0.0  }
 0x628   :  { %v1313_v17 = vmul.f32 %v2663_v58, %v3542_v62  ;;  %v2665_v2 = vpop.eup %2664  ;;  %v1716_v58 = vld [vmem:[%s3768_s3 + $0x10] sm:$0xff] }
 0x62a   :  { %v3623_v21 = vadd.f32 %v1314_v49, %v1313_v17  ;;  %v1717_v49 = vld [vmem:[%s3768_s3 + $0x18] sm:$0xff]  ;;  %v1718_v17 = vld [vmem:[%s3768_s3 + $0x20] sm:$0xff] }
 0x62b   :  { %v2549_v12 = vpack.c.bf16 %v1717_v49, %v1716_v58 }
 0x62c   :  { %2666 = vtanh.f32 %v3623_v21 }
 0x636   :  { %v2667_v3 = vpop.eup %2666 }
 0x637   :  { %v1317_v28 = vmul.f32 %v2667_v3, %v2665_v2  ;;  %v1720_v3 = vld [vmem:[%s3768_s3 + $0x30] sm:$0xff] }
 0x639   :  { %1415 = vmatmul.mubr.f32.vlgmr.msra.gmra.mrb[12].mxu0 %v1317_v28  ;;  %1486 = vmatmul.mubr.f32.vlgmr.msra.gmra.mrb[12].mxu1 %v1317_v28  ;;  %v1721_v28 = vld [vmem:[%s3768_s3 + $0x38] sm:$0xff] }
 0x63a   :  { %2468 = vmatpush1.bf16.msra.mxu0 %v2753_v7  ;;  %2508 = vmatpush1.bf16.msra.mxu1 %v2802_v24  ;;  %v1516_v7 = vld [vmem:[%s3766_s0 + $0x7] sm:$0x1] }
 0x63b   :  { %2470 = vmatprep.subr.bf16.mxu0 %v2755_v8  ;;  %2510 = vmatprep.subr.bf16.mxu1 %v2827_v32  ;;  %v1517_v8 = vld [vmem:[%s3766_s0 + $0xf] sm:$0x1]  ;;  %v1520_v24 = vld [vmem:[%s3766_s0 + $0x27] sm:$0x1] }
 0x63c   :  { %v1532_v32 = vrot.slane %v1517_v8, 7  ;;  %v1722_v8 = vld [vmem:[%s3768_s3 + $0x40] sm:$0xff] }
 0x63e   :  { %2472 = vmatpush1.bf16.msra.mxu0 %v2771_v13  ;;  %2512 = vmatpush1.bf16.msra.mxu1 %v2838_v36  ;;  %v1518_v13 = vld [vmem:[%s3766_s0 + $0x17] sm:$0x1] }
 0x63f   :  { %2474 = vmatprep.subr.bf16.mxu0 %v2780_v16  ;;  %2514 = vmatprep.subr.bf16.mxu1 %v2862_v44  ;;  %v1519_v16 = vld [vmem:[%s3766_s0 + $0x1f] sm:$0x1]  ;;  %v1534_v36 = vrot.slane %v1518_v13, 6  ;;  %v1723_v13 = vld [vmem:[%s3768_s3 + $0x48] sm:$0xff] }
 0x640   :  { %v1536_v44 = vrot.slane %v1519_v16, 5  ;;  %v2558_v16 = vpack.c.bf16 %v1723_v13, %v1722_v8 }
 0x642   :  { %2476 = vmatpush1.bf16.msra.mxu0 %v2805_v25  ;;  %2516 = vmatpush1.bf16.msra.mxu1 %v2871_v47  ;;  %v1521_v25 = vld [vmem:[%s3766_s0 + $0x2f] sm:$0x1]  ;;  %v1533_v47 = vsel %vm139_vm0, %v1532_v32, %v1516_v7  ;;  %v2555_v7 = vpack.c.bf16 %v1721_v28, %v1720_v3 }
 0x643   :  { %2478 = vmatprep.subr.bf16.mxu0 %v2818_v29  ;;  %2518 = vmatprep.subr.bf16.mxu1 %v2883_v51  ;;  %v1522_v29 = vld [vmem:[%s3766_s0 + $0x37] sm:$0x1]  ;;  %v1540_v51 = vrot.slane %v1521_v25, 3  ;;  %v1725_v25 = vld [vmem:[%s3768_s3 + $0x58] sm:$0xff] }
 0x646   :  { %2480 = vmatpush1.bf16.msra.mxu0 %v2854_v41  ;;  %2520 = vmatpush1.bf16.msra.mxu1 %v2913_v61  ;;  %v1523_v41 = vld [vmem:[%s3766_s0 + $0x3f] sm:$0x1] }
 0x647   :  { %2482 = vmatprep.subr.bf16.mxu0 %v2865_v45  ;;  %2522 = vmatprep.subr.bf16.mxu1 %v2919_v63  ;;  %v1538_v45 = vrot.slane %v1520_v24, 4  ;;  %v1544_v63 = vrot.slane %v1523_v41, 1  ;;  %v1724_v24 = vld [vmem:[%s3768_s3 + $0x50] sm:$0xff]  ;;  %v3779_v41 = vmov 0.0  }
 0x648   :  { %v2561_v32 = vpack.c.bf16 %v1725_v25, %v1724_v24 }
 0x64a   :  { %2484 = vmatpush1.bf16.msra.mxu0 %v2892_v54  ;;  %2524 = vmatpush1.bf16.msra.mxu1 %v2955_v15  ;;  %v1535_v54 = vsel %vm142_vm1, %v1534_v36, %v1533_v47  ;;  %v1727_v36 = vld [vmem:[%s3768_s3 + $0x68] sm:$0xff]  ;;  %v1729_v47 = vld [vmem:[%s3768_s3 + $0x78] sm:$0xff] }
 0x64b   :  { %2486 = vmatprep.subr.bf16.mxu0 %v2901_v57  ;;  %2526 = vmatprep.subr.bf16.mxu1 %v2967_v20  ;;  %v1542_v57 = vrot.slane %v1522_v29, 2  ;;  %v1537_v61 = vsel %vm145_vm2, %v1536_v44, %v1535_v54  ;;  %v1726_v29 = vld [vmem:[%s3768_s3 + $0x60] sm:$0xff] }
 0x64c   :  { %v2564_v44 = vpack.c.bf16 %v1727_v36, %v1726_v29 }
 0x64e   :  { %2488 = vmatpush1.bf16.msra.mxu0 %v2940_v9  ;;  %2528 = vmatpush1.bf16.msra.mxu1 %v3003_v40  ;;  %v1539_v9 = vsel %vm148_vm3, %v1538_v45, %v1537_v61  ;;  %v1728_v45 = vld [vmem:[%s3768_s3 + $0x70] sm:$0xff] }
 0x64f   :  { %2490 = vmatprep.subr.bf16.mxu0 %v2952_v14  ;;  %2530 = vmatprep.subr.bf16.mxu1 %v3015_v50  ;;  %v1541_v14 = vsel %vm151_vm4, %v1540_v51, %v1539_v9  ;;  %v2567_v51 = vpack.c.bf16 %v1729_v47, %v1728_v45 }
 0x650   :  { %v1543_v15 = vsel %vm154_vm5, %v1542_v57, %v1541_v14 }
 0x651   :  { %v1545_v20 = vsel %vm157_vm6, %v1544_v63, %v1543_v15 }
 0x652   :  { %2492 = vmatpush1.bf16.msra.mxu0 %v2988_v31  ;;  %2532 = vmatpush1.bf16.msra.mxu1 %v3054_v18 }
 0x653   :  { %2494 = vmatprep.subr.bf16.mxu0 %v2994_v37  ;;  %2534 = vmatprep.subr.bf16.mxu1 %v3057_v22 }
 0x654   :  { %1847 = vmatprep.mubr.msk.f32.mxu0 %vm159_vm7, %v1545_v20  ;;  %1848 = vmatprep.mubr.msk.f32.mxu1 %vm159_vm7, %v1545_v20 }
 0x656   :  { %2496 = vmatpush1.bf16.msra.mxu0 %v3026_v60  ;;  %2536 = vmatpush1.bf16.msra.mxu1 %v3086_v39 }
 0x657   :  { %2498 = vmatprep.subr.bf16.mxu0 %v3036_v4  ;;  %2538 = vmatprep.subr.bf16.mxu1 %v3090_v42 }
 0x65a   :  { %2500 = vmatpush1.bf16.msra.mxu0 %v3066_v27  ;;  %2540 = vmatpush1.bf16.msra.mxu1 %v3109_v53 }
 0x65b   :  { %2502 = vmatprep.subr.bf16.mxu0 %v3076_v34  ;;  %2542 = vmatprep.subr.bf16.mxu1 %v3112_v55 }
 0x65e   :  { %2504 = vmatpush1.bf16.msra.mxu0 %v3099_v48  ;;  %2544 = vmatpush1.bf16.msra.mxu1 %v3123_v59 }
 0x65f   :  { %2545 = vmatprep.subr.bf16.mxu0 %v2701_v0 }
 0x70c   :  { %v1416_v31 = vpop.f32.mrb[12].mxu0  ;;  %v1487_v37 = vpop.f32.mrb[12].mxu1 }
 0x70d   :  { %v1417_v40 = vadd.f32 %v1416_v31, %v3206_v6  ;;  %v1418_v50 = vpop.f32.mrb[13].mxu0  ;;  %v1489_v60 = vpop.f32.mrb[13].mxu1  ;;  %v1488_v39 = vadd.f32 %v1487_v37, %v3214_v43 }
 0x70e   :  { %v1419_v4 = vadd.f32 %v1418_v50, %v3208_v10  ;;  %v1490_v27 = vadd.f32 %v1489_v60, %v3212_v33 }
 0x70f   :  { %v1844_v18 = vmul.f32 -1.442695, %v1417_v40 }
 0x710   :  { %v1845_v22 = vmul.f32 -1.442695, %v1419_v4  ;;  %v1846_v34 = vmul.f32 -1.442695, %v1490_v27 }
 0x711   :  { %2668 = vpow2.f32 %v1844_v18 }
 0x712   :  { %2670 = vpow2.f32 %v1845_v22 }
 0x713   :  { %2672 = vpow2.f32 %v1846_v34 }
 0x714   :  { %2674 = vtanh.f32 %v1488_v39 }
 0x71b   :  { %v2669_v42 = vpop.eup %2668 }
 0x71c   :  { %v2671_v48 = vpop.eup %2670  ;;  %v1495_v53 = vadd.f32 1.0, %v2669_v42 }
 0x71d   :  { %v1501_v55 = vadd.f32 1.0, %v2671_v48  ;;  %v2673_v59 = vpop.eup %2672 }
 0x71e   :  { %2676 = vrcp.f32 %v1495_v53  ;;  %v2675_v62 = vpop.eup %2674  ;;  %v1508_v46 = vadd.f32 1.0, %v2673_v59 }
 0x71f   :  { %2678 = vrcp.f32 %v1501_v55  ;;  %v1852_v55 = vld [vmem:[%s3769_s4] ss:$0 sm:$0xff] }
 0x720   :  { %2680 = vrcp.f32 %v1508_v46 }
 0x728   :  { %v2677_v30 = vpop.eup %2676 }
 0x729   :  { %v2679_v23 = vpop.eup %2678  ;;  %v1512_v19 = vmul.f32 %v2677_v30, %v2675_v62 }
 0x72a   :  { %v1511_v35 = vmul.f32 %v2679_v23, %v3623_v21  ;;  %v2681_v26 = vpop.eup %2680  ;;  %v1719_v21 = vld [vmem:[%s3768_s3 + $0x28] sm:$0xff] }
 0x72b   :  { %v2552_v2 = vpack.c.bf16 %v1719_v21, %v1718_v17 }
 0x72c   :  { %v3702_v38 = vadd.f32 %v1512_v19, %v1511_v35 }
 0x72e   :  { %2682 = vtanh.f32 %v3702_v38 }
 0x738   :  { %v2683_v52 = vpop.eup %2682 }
 0x739   :  { %v1515_v1 = vmul.f32 %v2683_v52, %v2681_v26 }
 0x73b   :  { %1613 = vmatmul.mubr.f32.vlgmr.msra.gmra.mrb[14].mxu0 %v1515_v1  ;;  %1684 = vmatmul.mubr.f32.vlgmr.msra.gmra.mrb[14].mxu1 %v1515_v1 }
 0x73c   :  { %2547 = vmatpush3.bf16.msra.mxu0 %v2546_v5  ;;  %1902 = vmatprep.mubr.msk.f32.mxu0 %vm2702_vm8, %v3779_v41 }
 0x73d   :  { %2548 = vmatprep.subr.bf16.mxu0 %v2701_v0 }
 0x740   :  { %2550 = vmatpush3.bf16.msra.mxu0 %v2549_v12 }
 0x741   :  { %2551 = vmatprep.subr.bf16.mxu0 %v2701_v0 }
 0x744   :  { %2553 = vmatpush3.bf16.msra.mxu0 %v2552_v2 }
 0x745   :  { %2554 = vmatprep.subr.bf16.mxu0 %v2701_v0 }
 0x748   :  { %2556 = vmatpush3.bf16.msra.mxu0 %v2555_v7 }
 0x749   :  { %2557 = vmatprep.subr.bf16.mxu0 %v2701_v0 }
 0x74c   :  { %2559 = vmatpush3.bf16.msra.mxu0 %v2558_v16 }
 0x74d   :  { %2560 = vmatprep.subr.bf16.mxu0 %v2701_v0 }
 0x750   :  { %2562 = vmatpush3.bf16.msra.mxu0 %v2561_v32 }
 0x751   :  { %2563 = vmatprep.subr.bf16.mxu0 %v2701_v0 }
 0x754   :  { %2565 = vmatpush3.bf16.msra.mxu0 %v2564_v44 }
 0x755   :  { %2566 = vmatprep.subr.bf16.mxu0 %v2701_v0 }
 0x758   :  { %2568 = vmatpush3.bf16.msra.mxu0 %v2567_v51 }
 0x80e   :  { %v1614_v54 = vpop.f32.mrb[14].mxu0  ;;  %v1685_v57 = vpop.f32.mrb[14].mxu1 }
 0x80f   :  { %v1615_v61 = vadd.f32 %v1614_v54, %v3206_v6  ;;  %v1616_v63 = vpop.f32.mrb[15].mxu0  ;;  %v1687_v9 = vpop.f32.mrb[15].mxu1  ;;  %v1686_v40 = vadd.f32 %v1685_v57, %v3214_v43 }
 0x810   :  { %v1617_v14 = vadd.f32 %v1616_v63, %v3208_v10  ;;  %v1688_v31 = vadd.f32 %v1687_v9, %v3212_v33 }
 0x811   :  { %v1849_v15 = vmul.f32 -1.442695, %v1615_v61 }
 0x812   :  { %v1850_v20 = vmul.f32 -1.442695, %v1617_v14  ;;  %v1851_v37 = vmul.f32 -1.442695, %v1688_v31 }
 0x813   :  { %2684 = vpow2.f32 %v1849_v15 }
 0x814   :  { %2686 = vpow2.f32 %v1850_v20 }
 0x815   :  { %2688 = vpow2.f32 %v1851_v37 }
 0x816   :  { %2690 = vtanh.f32 %v1686_v40 }
 0x81d   :  { %v2685_v50 = vpop.eup %2684 }
 0x81e   :  { %v2687_v60 = vpop.eup %2686  ;;  %v1693_v4 = vadd.f32 1.0, %v2685_v50 }
 0x81f   :  { %v1699_v18 = vadd.f32 1.0, %v2687_v60  ;;  %v2689_v6 = vpop.eup %2688 }
 0x820   :  { %2692 = vrcp.f32 %v1693_v4  ;;  %v2691_v22 = vpop.eup %2690  ;;  %v1706_v39 = vadd.f32 1.0, %v2689_v6 }
 0x821   :  { %2694 = vrcp.f32 %v1699_v18 }
 0x822   :  { %2696 = vrcp.f32 %v1706_v39 }
 0x82a   :  { %v2693_v10 = vpop.eup %2692 }
 0x82b   :  { %v2695_v27 = vpop.eup %2694  ;;  %v1710_v34 = vmul.f32 %v2693_v10, %v2691_v22 }
 0x82c   :  { %v1709_v42 = vmul.f32 %v2695_v27, %v3702_v38  ;;  %v2697_v43 = vpop.eup %2696 }
 0x82e   :  { %v1711_v33 = vadd.f32 %v1710_v34, %v1709_v42 }
 0x830   :  { %2698 = vtanh.f32 %v1711_v33 }
 0x83a   :  { %v2699_v48 = vpop.eup %2698 }
 0x83b   :  { %v1713_v53 = vmul.f32 %v2699_v48, %v2697_v43 }
 0x83d   :  { %1903 = vmatmul.mubr.f32.vlgmr.msra.gmra.mrb[16].mxu0 %v1713_v53 }
 0x910   :  { %v1803_v59 = vpop.f32.mrb[16].mxu0 }
 0x911   :  { %v1804_v62 = vadd.f32 %v1852_v55, %v1803_v59  ;;  %v1904_v30 = vpop.f32.mrb[17].mxu0 }
 0x913   :  { %1807 = vst [vmem:[%s3770_s5] sm:$0xff] %v1804_v62 }

</bundles_post_ra>
